<compile_context>
chip_gen: v7x
topology: tpu7x:2x2x1
jax: 0.10.0
libtpu: 0.0.40
codegen_flags: <defaults>
</compile_context>

<pallas_src>
import functools

import jax
import jax.numpy as jnp
from jax.experimental import pallas as pl
from jax.experimental.pallas import tpu as pltpu


def _round_up(n: int, m: int) -> int:
    return ((n + m - 1) // m) * m


def _make_resnn_kernel(in_dim: int, hidden: int, out_dim: int, out_rows: int):
    """Fused ResNN forward for one (features, batch_tile) tile.

    Kernel refs:
      x_ref : (in_dim, Bt)        f32   streamed batch tile (batch on lanes)
      w_ref : (H, 4H)             bf16  [W1 | W2 | W_r | W_out (row-padded)]
      s_ref : (H, in_dim + 5)     f32   cols 0..in_dim-1 = columns of W_in,
                                        cols in_dim..in_dim+4 = biases
                                        [b_in, b1, b2, b_r, b_out (row-padded)]
      o_ref : (out_dim, Bt)       f32
    """
    H = hidden

    def kernel(x_ref, w_ref, s_ref, o_ref):
        x = x_ref[...]                                        # (in_dim, Bt) f32

        # ---- input_hidden_linear + tanh: K = in_dim broadcast FMAs on the VPU
        # (avoids a nearly-empty K=4 MXU pass).  W_in columns stay in f32.
        h = s_ref[:, in_dim:in_dim + 1]                       # b_in, (H, 1)
        for k in range(in_dim):                               # tiny static unroll
            h = h + s_ref[:, k:k + 1] * x[k:k + 1, :]         # (H,1)*(1,Bt)->(H,Bt)
        h = jnp.tanh(h)

        def mxu(layer, a, rows=H):
            # bf16 x bf16 MXU matmul, f32 accumulation.
            w = w_ref[:rows, layer * H:(layer + 1) * H]       # (rows, H) bf16
            return jnp.dot(w, a.astype(jnp.bfloat16),
                           preferred_element_type=jnp.float32)

        def bias(j, rows=H):
            return s_ref[:rows, in_dim + j:in_dim + j + 1]    # (rows, 1) f32

        # ---- ResidualBlock1d (input_dim == output_dim -> identity shortcut) --
        y = jnp.tanh(mxu(0, h) + bias(1))                     # linear1 + act1
        y = mxu(1, y) + bias(2)                               # linear2
        h = jnp.tanh(y + h)                                   # + shortcut, act2

        # ---- remaining hidden layer ----
        h = jnp.tanh(mxu(2, h) + bias(3))

        # ---- hidden_output_linear (no activation); only the first out_rows=8
        # weight/bias rows are real, rows >= out_dim are zero padding.
        out = mxu(3, h, rows=out_rows) + bias(4, rows=out_rows)   # (8, Bt)
        o_ref[...] = out[:out_dim, :].astype(o_ref.dtype)

    return kernel


@functools.partial(jax.jit, static_argnames=("out_dim", "batch_tile"))
def _resnn_forward_jit(x, w_slab, s_slab, *, out_dim, batch_tile):
    """x: (B, in_dim) f32 (PyTorch layout).  Returns (B, out_dim) f32."""
    B, in_dim = x.shape
    H = s_slab.shape[0]
    assert w_slab.shape == (H, 4 * H)
    assert s_slab.shape == (H, in_dim + 5)
    out_rows = 8                                   # row-padded output head

    # Tile the batch (lane axis).  Clamp to the padded batch for small B.
    bt = min(_round_up(int(batch_tile), 128), _round_up(B, 128))
    Bp = _round_up(B, bt)
    n_tiles = Bp // bt

    # Feature-major: batch on the 128-wide lane axis -> full lane occupancy for
    # the VPU/EUP work and lane-dense output stores even though out_dim == 3.
    # Under jit the transpose/pad fuse into the kernel's input fetch
    # (allow_input_fusion) instead of a separate HBM pass.
    xt = x.T
    if Bp != B:
        xt = jnp.pad(xt, ((0, 0), (0, Bp - B)))

    cost = pl.CostEstimate(
        flops=int(2 * B * H * (in_dim + 3 * H + out_rows)),
        transcendentals=int(4 * H * B),
        bytes_accessed=int(4 * B * (in_dim + out_dim)
                           + w_slab.size * 2 + s_slab.size * 4),
    )

    kernel = _make_resnn_kernel(in_dim, H, out_dim, out_rows)

    out_t = pl.pallas_call(
        kernel,
        out_shape=jax.ShapeDtypeStruct((out_dim, Bp), jnp.float32),
        grid_spec=pltpu.PrefetchScalarGridSpec(
            num_scalar_prefetch=0,
            grid=(n_tiles,),
            in_specs=[
                pl.BlockSpec((in_dim, bt), lambda i: (0, i)),
                # Constant-index parameter slabs: DMA'd once, stay resident.
                pl.BlockSpec((H, 4 * H), lambda i: (0, 0)),
                pl.BlockSpec((H, in_dim + 5), lambda i: (0, 0)),
            ],
            out_specs=pl.BlockSpec((out_dim, bt), lambda i: (0, i)),
        ),
        compiler_params=pltpu.CompilerParams(
            # Batch axis is independent; on v7x this lets the 2 TensorCores
            # split the (even, >=4 step) grid.  (pltpu.CORE_PARALLEL is a
            # per-chip alternative worth trying on v7x.)
            dimension_semantics=("parallel",),
            # Allow XLA to fuse the x transpose/pad into the input fetch.
            allow_input_fusion=[True, False, False],
        ),
        cost_estimate=cost,
    )(xt, w_slab, s_slab)

    return out_t[:, :B].T                          # back to (B, out_dim)


def resnn_forward(x, params, *, batch_tile=2048):
    return _resnn_forward_jit(x, params["w_slab"], params["s_slab"],
                              out_dim=int(params["out_dim"]),
                              batch_tile=int(batch_tile))


# ---------------------------------------------------------------------------
# Parameter construction: raw f32 weights (for the reference) + packed slabs.
# ---------------------------------------------------------------------------
def init_params(key, layer_sizes):
    in_dim, H, out_dim = layer_sizes[0], layer_sizes[1], layer_sizes[-1]
    hidden_depth = len(layer_sizes) - 2
    # TODO(synk): the fused kernel is specialized to hidden_depth == 4
    # (1 residual block + 1 remaining hidden layer); deeper configs need extra
    # slab columns and a loop over blocks.
    assert hidden_depth == 4 and all(s == H for s in layer_sizes[1:-1])
    assert out_dim <= 8

    def glorot(k, fan_out, fan_in):
        std = (2.0 / (fan_in + fan_out)) ** 0.5
        return std * jax.random.normal(k, (fan_out, fan_in), dtype=jnp.float32)

    ks = jax.random.split(key, 10)
    # PyTorch nn.Linear weight orientation: (out_features, in_features).
    w_in = glorot(ks[0], H, in_dim)          # input_hidden_linear
    w1 = glorot(ks[1], H, H)                 # block.linear1
    w2 = glorot(ks[2], H, H)                 # block.linear2
    w_r = glorot(ks[3], H, H)                # remaining hidden layer
    w_out = glorot(ks[4], out_dim, H)        # hidden_output_linear

    # The module zero-inits biases; small nonzero biases are used here only so
    # the self-test exercises the bias path (forward semantics are identical).
    b_in = 0.05 * jax.random.normal(ks[5], (H,), jnp.float32)
    b1 = 0.05 * jax.random.normal(ks[6], (H,), jnp.float32)
    b2 = 0.05 * jax.random.normal(ks[7], (H,), jnp.float32)
    b_r = 0.05 * jax.random.normal(ks[8], (H,), jnp.float32)
    b_out = 0.05 * jax.random.normal(ks[9], (out_dim,), jnp.float32)

    # Lane-dense bf16 MXU slab: (H, 4H) = [W1 | W2 | W_r | W_out(row-padded)].
    w_out_pad = jnp.zeros((H, H), jnp.float32).at[:out_dim, :].set(w_out)
    w_slab = jnp.concatenate([w1, w2, w_r, w_out_pad], axis=1).astype(jnp.bfloat16)

    # Small f32 slab (H, in_dim+5): W_in columns (exact f32 VPU input layer)
    # followed by the 5 biases (b_out row-padded).
    b_out_pad = jnp.zeros((H,), jnp.float32).at[:out_dim].set(b_out)
    s_slab = jnp.concatenate(
        [w_in] + [b[:, None] for b in (b_in, b1, b2, b_r, b_out_pad)], axis=1)

    return dict(w_slab=w_slab, s_slab=s_slab,
                w_in=w_in, w1=w1, w2=w2, w_r=w_r, w_out=w_out,
                b_in=b_in, b1=b1, b2=b2, b_r=b_r, b_out=b_out,
                in_dim=in_dim, hidden_dim=H, out_dim=out_dim)


# ---------------------------------------------------------------------------
# Pure-f32 JAX reference mirroring the PyTorch ResNN forward exactly.
# ---------------------------------------------------------------------------
def resnn_reference(x, params):
    hp = jax.lax.Precision.HIGHEST
    dot = lambda a, w: jnp.dot(a, w.T, precision=hp)
    h = jnp.tanh(dot(x, params["w_in"]) + params["b_in"])      # input layer
    y = jnp.tanh(dot(h, params["w1"]) + params["b1"])          # block.linear1
    y = dot(y, params["w2"]) + params["b2"]                    # block.linear2
    h = jnp.tanh(y + h)                                        # shortcut + act2
    h = jnp.tanh(dot(h, params["w_r"]) + params["b_r"])        # remaining hidden
    return dot(h, params["w_out"]) + params["b_out"]           # output (no act)


if __name__ == "__main__":
    layer_sizes = [4, 32, 32, 32, 32, 3]   # in=4, hidden=32 (depth 4), out=3
    batch = 4096
    batch_tile = 1024                      # grid of 4: even, pipelined, v7x-shardable

    key = jax.random.PRNGKey(0)
    k_x, k_p = jax.random.split(key)
    x = jax.random.normal(k_x, (batch, layer_sizes[0]), dtype=jnp.float32)
    params = init_params(k_p, layer_sizes)

    out = jax.block_until_ready(resnn_forward(x, params, batch_tile=batch_tile))
    ref = resnn_reference(x, params)

    assert out.shape == (batch, layer_sizes[-1]), out.shape
    max_err = float(jnp.max(jnp.abs(out - ref)))
    # Documented tolerance: the kernel uses bf16 MXU operands (f32 accumulation)
    # against a pure-f32 reference; worst-case absolute error is ~1e-2-level.
    assert max_err < 3e-2, f"max |err| vs f32 reference = {max_err}"
    print("KERNEL_OK")
</pallas_src>

<mosaic_0001>
module attributes {stable_mosaic.version = 11 : i64} {
  func.func @kernel(%arg0: i32, %arg1: memref<4x1024xf32, #tpu.memory_space<vmem>>, %arg2: memref<32x128xbf16, #tpu.memory_space<vmem>>, %arg3: memref<32x9xf32, #tpu.memory_space<vmem>>, %arg4: memref<3x1024xf32, #tpu.memory_space<vmem>>) attributes {dimension_semantics = [#tpu.dimension_semantics<parallel>], iteration_bounds = array<i64: 4>, scalar_prefetch = 0 : i64, scratch_operands = 0 : i64, tpu.core_type = #tpu.core_type<tc>, window_params = [{transform_indices = @transform_0, window_bounds = array<i64: 4, 1024>}, {pipeline_mode = #tpu.pipeline_mode<synchronous>, transform_indices = @transform_1, window_bounds = array<i64: 32, 128>}, {pipeline_mode = #tpu.pipeline_mode<synchronous>, transform_indices = @transform_2, window_bounds = array<i64: 32, 9>}, {transform_indices = @transform_3, window_bounds = array<i64: 3, 1024>}]} {
    %c0 = arith.constant 0 : index
    %c0_0 = arith.constant 0 : index
    %0 = vector.load %arg1[%c0, %c0_0] : memref<4x1024xf32, #tpu.memory_space<vmem>>, vector<4x1024xf32>
    %c0_1 = arith.constant 0 : index
    %c4 = arith.constant 4 : index
    %1 = vector.load %arg3[%c0_1, %c4] : memref<32x9xf32, #tpu.memory_space<vmem>>, vector<32x1xf32>
    %c0_2 = arith.constant 0 : index
    %c0_3 = arith.constant 0 : index
    %2 = vector.load %arg3[%c0_2, %c0_3] : memref<32x9xf32, #tpu.memory_space<vmem>>, vector<32x1xf32>
    %3 = vector.extract_strided_slice %0 {offsets = [0, 0], sizes = [1, 1024], strides = [1, 1]} : vector<4x1024xf32> to vector<1x1024xf32>
    %4 = vector.broadcast %2 : vector<32x1xf32> to vector<32x1024xf32>
    %5 = vector.broadcast %3 : vector<1x1024xf32> to vector<32x1024xf32>
    %6 = arith.mulf %4, %5 : vector<32x1024xf32>
    %7 = vector.broadcast %1 : vector<32x1xf32> to vector<32x1024xf32>
    %8 = arith.addf %7, %6 : vector<32x1024xf32>
    %c0_4 = arith.constant 0 : index
    %c1 = arith.constant 1 : index
    %9 = vector.load %arg3[%c0_4, %c1] : memref<32x9xf32, #tpu.memory_space<vmem>>, vector<32x1xf32>
    %10 = vector.extract_strided_slice %0 {offsets = [1, 0], sizes = [1, 1024], strides = [1, 1]} : vector<4x1024xf32> to vector<1x1024xf32>
    %11 = vector.broadcast %9 : vector<32x1xf32> to vector<32x1024xf32>
    %12 = vector.broadcast %10 : vector<1x1024xf32> to vector<32x1024xf32>
    %13 = arith.mulf %11, %12 : vector<32x1024xf32>
    %14 = arith.addf %8, %13 : vector<32x1024xf32>
    %c0_5 = arith.constant 0 : index
    %c2 = arith.constant 2 : index
    %15 = vector.load %arg3[%c0_5, %c2] : memref<32x9xf32, #tpu.memory_space<vmem>>, vector<32x1xf32>
    %16 = vector.extract_strided_slice %0 {offsets = [2, 0], sizes = [1, 1024], strides = [1, 1]} : vector<4x1024xf32> to vector<1x1024xf32>
    %17 = vector.broadcast %15 : vector<32x1xf32> to vector<32x1024xf32>
    %18 = vector.broadcast %16 : vector<1x1024xf32> to vector<32x1024xf32>
    %19 = arith.mulf %17, %18 : vector<32x1024xf32>
    %20 = arith.addf %14, %19 : vector<32x1024xf32>
    %c0_6 = arith.constant 0 : index
    %c3 = arith.constant 3 : index
    %21 = vector.load %arg3[%c0_6, %c3] : memref<32x9xf32, #tpu.memory_space<vmem>>, vector<32x1xf32>
    %22 = vector.extract_strided_slice %0 {offsets = [3, 0], sizes = [1, 1024], strides = [1, 1]} : vector<4x1024xf32> to vector<1x1024xf32>
    %23 = vector.broadcast %21 : vector<32x1xf32> to vector<32x1024xf32>
    %24 = vector.broadcast %22 : vector<1x1024xf32> to vector<32x1024xf32>
    %25 = arith.mulf %23, %24 : vector<32x1024xf32>
    %26 = arith.addf %20, %25 : vector<32x1024xf32>
    %27 = math.tanh %26 : vector<32x1024xf32>
    %c0_7 = arith.constant 0 : index
    %c0_8 = arith.constant 0 : index
    %28 = vector.load %arg2[%c0_7, %c0_8] : memref<32x128xbf16, #tpu.memory_space<vmem>>, vector<32x32xbf16>
    %29 = arith.truncf %27 : vector<32x1024xf32> to vector<32x1024xbf16>
    %cst = arith.constant dense<0.000000e+00> : vector<32x1024xf32>
    %30 = tpu.matmul %28, %29, %cst {dimension_numbers = #tpu.dot_dimension_numbers<[1], [0], [0], [1], [0, 0, 1, 1], [], []>} : vector<32x32xbf16>, vector<32x1024xbf16>, vector<32x1024xf32> -> vector<32x1024xf32>
    %c0_9 = arith.constant 0 : index
    %c5 = arith.constant 5 : index
    %31 = vector.load %arg3[%c0_9, %c5] : memref<32x9xf32, #tpu.memory_space<vmem>>, vector<32x1xf32>
    %32 = vector.broadcast %31 : vector<32x1xf32> to vector<32x1024xf32>
    %33 = arith.addf %30, %32 : vector<32x1024xf32>
    %34 = math.tanh %33 : vector<32x1024xf32>
    %c0_10 = arith.constant 0 : index
    %c32 = arith.constant 32 : index
    %35 = vector.load %arg2[%c0_10, %c32] : memref<32x128xbf16, #tpu.memory_space<vmem>>, vector<32x32xbf16>
    %36 = arith.truncf %34 : vector<32x1024xf32> to vector<32x1024xbf16>
    %cst_11 = arith.constant dense<0.000000e+00> : vector<32x1024xf32>
    %37 = tpu.matmul %35, %36, %cst_11 {dimension_numbers = #tpu.dot_dimension_numbers<[1], [0], [0], [1], [0, 0, 1, 1], [], []>} : vector<32x32xbf16>, vector<32x1024xbf16>, vector<32x1024xf32> -> vector<32x1024xf32>
    %c0_12 = arith.constant 0 : index
    %c6 = arith.constant 6 : index
    %38 = vector.load %arg3[%c0_12, %c6] : memref<32x9xf32, #tpu.memory_space<vmem>>, vector<32x1xf32>
    %39 = vector.broadcast %38 : vector<32x1xf32> to vector<32x1024xf32>
    %40 = arith.addf %37, %39 : vector<32x1024xf32>
    %41 = arith.addf %40, %27 : vector<32x1024xf32>
    %42 = math.tanh %41 : vector<32x1024xf32>
    %c0_13 = arith.constant 0 : index
    %c64 = arith.constant 64 : index
    %43 = vector.load %arg2[%c0_13, %c64] : memref<32x128xbf16, #tpu.memory_space<vmem>>, vector<32x32xbf16>
    %44 = arith.truncf %42 : vector<32x1024xf32> to vector<32x1024xbf16>
    %cst_14 = arith.constant dense<0.000000e+00> : vector<32x1024xf32>
    %45 = tpu.matmul %43, %44, %cst_14 {dimension_numbers = #tpu.dot_dimension_numbers<[1], [0], [0], [1], [0, 0, 1, 1], [], []>} : vector<32x32xbf16>, vector<32x1024xbf16>, vector<32x1024xf32> -> vector<32x1024xf32>
    %c0_15 = arith.constant 0 : index
    %c7 = arith.constant 7 : index
    %46 = vector.load %arg3[%c0_15, %c7] : memref<32x9xf32, #tpu.memory_space<vmem>>, vector<32x1xf32>
    %47 = vector.broadcast %46 : vector<32x1xf32> to vector<32x1024xf32>
    %48 = arith.addf %45, %47 : vector<32x1024xf32>
    %49 = math.tanh %48 : vector<32x1024xf32>
    %c0_16 = arith.constant 0 : index
    %c96 = arith.constant 96 : index
    %50 = vector.load %arg2[%c0_16, %c96] : memref<32x128xbf16, #tpu.memory_space<vmem>>, vector<8x32xbf16>
    %51 = arith.truncf %49 : vector<32x1024xf32> to vector<32x1024xbf16>
    %cst_17 = arith.constant dense<0.000000e+00> : vector<8x1024xf32>
    %52 = tpu.matmul %50, %51, %cst_17 {dimension_numbers = #tpu.dot_dimension_numbers<[1], [0], [0], [1], [0, 0, 1, 1], [], []>} : vector<8x32xbf16>, vector<32x1024xbf16>, vector<8x1024xf32> -> vector<8x1024xf32>
    %c0_18 = arith.constant 0 : index
    %c8 = arith.constant 8 : index
    %53 = vector.load %arg3[%c0_18, %c8] : memref<32x9xf32, #tpu.memory_space<vmem>>, vector<8x1xf32>
    %54 = vector.broadcast %53 : vector<8x1xf32> to vector<8x1024xf32>
    %55 = arith.addf %52, %54 : vector<8x1024xf32>
    %56 = vector.extract_strided_slice %55 {offsets = [0, 0], sizes = [3, 1024], strides = [1, 1]} : vector<8x1024xf32> to vector<3x1024xf32>
    %c0_19 = arith.constant 0 : index
    %c0_20 = arith.constant 0 : index
    %57 = vector.load %arg4[%c0_19, %c0_20] : memref<3x1024xf32, #tpu.memory_space<vmem>>, vector<3x1024xf32>
    tpu.vector_store %arg4[%c0_19, %c0_20], %56 {strides = array<i32>} : memref<3x1024xf32, #tpu.memory_space<vmem>>, vector<3x1024xf32>,
    return
  }
  func.func @transform_0(%arg0: i32) -> (i32, i32) {
    %c0_i32 = arith.constant 0 : i32
    %c0_i32_0 = arith.constant 0 : i32
    return %c0_i32, %arg0 : i32, i32
  }
  func.func @transform_1(%arg0: i32) -> (i32, i32) {
    %c0_i32 = arith.constant 0 : i32
    %c0_i32_0 = arith.constant 0 : i32
    %c0_i32_1 = arith.constant 0 : i32
    return %c0_i32, %c0_i32_0 : i32, i32
  }
  func.func @transform_2(%arg0: i32) -> (i32, i32) {
    %c0_i32 = arith.constant 0 : i32
    %c0_i32_0 = arith.constant 0 : i32
    %c0_i32_1 = arith.constant 0 : i32
    return %c0_i32, %c0_i32_0 : i32, i32
  }
  func.func @transform_3(%arg0: i32) -> (i32, i32) {
    %c0_i32 = arith.constant 0 : i32
    %c0_i32_0 = arith.constant 0 : i32
    return %c0_i32, %arg0 : i32, i32
  }
}

</mosaic_0001>

<bundles_post_ra>
// kernel: _resnn_forward_jit.2
= control target key start
LH: loop header
LB: loop body
LE: loop exit
PB: predicated region body
PF: predicated region fallthrough
CT: control target
= control target key end

     0   :  { %8 = vsyncpa [#allocation3], 0  ;;  %s3586_s0 = inlined_call_operand.vmem [shape: bf16[32,128], index: 0, kind: input, shape index: {}]   ;;  %s3587_s1 = inlined_call_operand.vmem [shape: f32[32,9], index: 1, kind: input, shape index: {}]   ;;  %s3588_s2 = inlined_call_operand.vmem [shape: f32[4096,4], index: 2, kind: input, shape index: {}]   ;;  %s3589_s3 = inlined_call_operand.hbm [shape: f32[3,4096], index: 3, kind: output, shape index: {}]  }
   0x1   :  { %10 = vsyncpa [#allocation3 + $0x1], 0  ;;  %s2556_s12 = smov 0   ;;  %s2558_s13 = smov 0  }
   0x2   :  { %s2560_s14 = smov 0   ;;  %s2562_s15 = smov 0  }
   0x3 LB: > { %s2577_s16 = sadd.s32 4294967295, %s2521_s15   ;;  %s2073_s17 = sadd.s32 4294967294, %s2521_s15   ;;  %s2521_s15 = sphi %s2562_s15, %s3673_s15   ;;  %s2517_s14 = sphi %s2560_s14, %s3672_s14   ;;  %s2513_s13 = sphi %s2558_s13, %s3671_s13   ;;  %s2509_s12 = sphi %s2556_s12, %s3670_s12  }
   0x4   : > { %s2581_s18 = sadd.s32 1, %s2521_s15   ;;  %s91_s19 = sadd.s32 1, %s2517_s14 }
   0x5   : > { %s88_s20 = ssub.s32 %s2521_s15, %s2581_s18  ;;  %p101_p0 = scmp.ne.s32.totalorder %s2517_s14, %s2513_s13 }
   0x6   : > { %p89_p1 = scmp.eq.s32.totalorder %s88_s20, 0  ;;  %p102_p2 = scmp.eq.s32.totalorder %s2577_s16, 3 }
   0x7   : > { %p107_p3 = scmp.ne.s32.totalorder %s2513_s13, %s2509_s12  ;;  %p108_p4 = scmp.eq.s32.totalorder %s2073_s17, 3 }
   0x8   : > { %s2592_s21 = scalar_select %p89_p1, %s2517_s14, %s91_s19  }
   0x9   : > { %p2594_p5 = por %p102_p2, %p101_p0  ;;  %p2598_p6 = por %p108_p4, %p107_p3 }
   0xa   : > { %p2076_p7 = scmp.ge.s32.totalorder %s2521_s15, 1  ;;  %p141_p8 = scmp.lt.s32.totalorder %s2521_s15, 5 }
   0xc   : > { %p142_p9 = pnand %p2076_p7, %p141_p8 }
   0xe   : > { %145 = sbr.rel (%p142_p9) target bundleno = 1217 (0x4c1), region = 32 }
  0x15   : > { %v215_v0 = vld [vmem:[%s3587_s1] sm:$0xff]  ;;  %v2523_v1 = vmov 4   ;;  %v3590_v2 = vmov 0   ;;  %s2078_s26 = sshll.u32 %s2577_s16, 3  ;;  %v216_v3 = vld [vmem:[%s3587_s1 + $0x8] sm:$0xff]  ;;  %v2617_v4 = vld [vmem:[%s3587_s1 + $0x18] sm:$0xff]  ;;  %v243_v13 = vlaneseq }
  0x16   : > { %2176 = vset.pattern.permute.xlu1 %v2523_v1  ;;  %2175 = vset.pattern.permute.xlu0 %v3590_v2  ;;  %p166_p10 = scmp.lt.s32.totalorder %s2078_s26, 31  ;;  %v2525_v9 = vmov 1   ;;  %v217_v10 = vld [vmem:[%s3587_s1 + $0x10] sm:$0xff]  ;;  %v2526_v11 = vmov 2   ;;  %v2527_v12 = vmov 3   ;;  %v2528_v15 = vmov 5  }
  0x17   : > { %348 = vperm.xlu1 %2176, %v215_v0   ;;  %221 = vperm.xlu0 %2175, %v215_v0   ;;  %v244_v14 = vshrl.u32 %v243_v13, 7  ;;  %v2634_v17 = vld [vmem:[%s3586_s0 + $0x8] sm:$0xff]   ;;  %s2529_s17 = smov 96   ;;  %v2661_v35 = vld [vmem:[%s3586_s0] sm:$0xff]   ;;  %vm929_vm0 = vcmask 261120   ;;  %s2531_s30 = smov 64  }
  0x18   : > { %968 = vmatprep.mubr.bf16.mxu0 %v3590_v2  ;;  %1021 = vmatprep.mubr.bf16.mxu1 %v3590_v2  ;;  %s3675_s26 = smov (!%p166_p10, %s2078_s26), 31  ;;  %3607 = vst [vmem:[#allocation6_spill] sm:$0xff] %v2634_v17  ;;  %3608 = vst [vmem:[#allocation7_spill] sm:$0xff] %v2661_v35  ;;  %s2533_s8 = smov 32  }
  0x19   : > { %s2079_s29 = sshll.u32 %s3675_s26, 2  ;;  %v245_v16 = vsub.s32 0, %v244_v14  ;;  %v249_v21 = vsub.s32 4, %v244_v14  ;;  %v413_v24 = vsub.s32 1, %v244_v14  ;;  %v417_v25 = vsub.s32 5, %v244_v14  ;;  %s162_s11 = sand.u32 1, %s2513_s13  }
  0x1a   : > { %s169_s7 = scalar_lea.vmem %s3588_s2, %s2079_s29  ;;  %v2648_v28 = vsub.s32 2, %v244_v14  ;;  %v569_v47 = vsub.s32 6, %v244_v14  ;;  %v717_v54 = vsub.s32 3, %v244_v14  ;;  %v721_v55 = vsub.s32 7, %v244_v14  ;;  %s2123_s20 = sshll.u32 %s2577_s16, 9 }
  0x1b   : > { %352 = vperm.xlu1 %2176, %v216_v3   ;;  %226 = vperm.xlu0 %2175, %v216_v3   ;;  %v172_v5 = vld [vmem:[%s169_s7] sm:$0xff]   ;;  %v2081_v6 = vld [vmem:[%s169_s7 + $0x8] sm:$0xff]   ;;  %v2083_v7 = vld [vmem:[%s169_s7 + $0x10] sm:$0xff]   ;;  %s3542_s27 = scalar_lea.hbm %s3589_s3, %s2123_s20  ;;  %s2000_s16 = scalar_lea.sflag [#allocation3], %s162_s11 }
  0x1c   : > { %174 = vst [vmem:[#allocation4] sm:$0xff] %v172_v5   ;;  %184 = vst [vmem:[#allocation4 + $0x8] sm:$0xff] %v2081_v6   ;;  %v2085_v8 = vld [vmem:[%s169_s7 + $0x18] sm:$0xff]   ;;  %s2535_s29 = smov [#allocation2]  }
  0x1d   : > { %194 = vst [vmem:[#allocation4 + $0x10] sm:$0xff] %v2083_v7   ;;  %204 = vst [vmem:[#allocation4 + $0x18] sm:$0xff] %v2085_v8  }
  0x1f   : > { %2177 = vset.pattern.permute.xlu1 %v2525_v9  ;;  %236 = vperm.xlu0 %2175, %v2617_v4  }
  0x20   : > { %400 = vperm.xlu1 %2177, %v216_v3  }
  0x23   : > { %2180 = vset.pattern.permute.xlu0 %v2523_v1  ;;  %v2636_v18 = vld [vmem:[#allocation4] sm:$0xff]  ;;  %v2638_v19 = vld [vmem:[#allocation4 + $0x8] sm:$0xff] }
  0x24   : > { %2178 = vset.pattern.permute.xlu1 %v3590_v2  ;;  %356 = vperm.xlu0 %2180, %v217_v10   ;;  %v2640_v20 = vld [vmem:[#allocation4 + $0x10] sm:$0xff]  ;;  %v2643_v22 = vld [vmem:[#allocation4 + $0x18] sm:$0xff]  ;;  %v246_v23 = vrot.slane %v2636_v18, %v245_v16  ;;  %v254_v26 = vrot.slane %v2638_v19, %v245_v16  ;;  %v250_v40 = vrot.slane %v2636_v18, %v249_v21 }
  0x25   : > { %231 = vperm.xlu1 %2178, %v217_v10   ;;  %v262_v27 = vrot.slane %v2640_v20, %v245_v16  ;;  %v266_v29 = vrot.slane %v2640_v20, %v249_v21  ;;  %v270_v30 = vrot.slane %v2643_v22, %v245_v16  ;;  %v274_v31 = vrot.slane %v2643_v22, %v249_v21 }
  0x26   : > { %v2654_v32 = vrot.slane %v246_v23, %v245_v16  ;;  %v430_v33 = vrot.slane %v2640_v20, %v413_v24  ;;  %v434_v34 = vrot.slane %v2640_v20, %v417_v25  ;;  %v2663_v36 = vrot.slane %v254_v26, %v245_v16 }
  0x27   : > { %v2665_v37 = vrot.slane %v262_v27, %v245_v16  ;;  %v438_v38 = vrot.slane %v2643_v22, %v413_v24  ;;  %v442_v39 = vrot.slane %v2643_v22, %v417_v25  ;;  %v258_v41 = vrot.slane %v2638_v19, %v249_v21 }
  0x28   : > { %2181 = vset.pattern.permute.xlu0 %v2525_v9  ;;  %v582_v42 = vrot.slane %v2640_v20, %v2648_v28  ;;  %v590_v43 = vrot.slane %v2643_v22, %v2648_v28  ;;  %v2676_v44 = vrot.slane %v266_v29, %v245_v16  ;;  %v2678_v45 = vrot.slane %v270_v30, %v245_v16 }
  0x29   : > { %2179 = vset.pattern.permute.xlu1 %v2526_v11  ;;  %396 = vperm.xlu0 %2181, %v215_v0   ;;  %v2680_v46 = vrot.slane %v274_v31, %v245_v16  ;;  %v2682_v48 = vrot.slane %v430_v33, %v413_v24  ;;  %v2684_v49 = vrot.slane %v434_v34, %v413_v24 }
  0x2a   : > { %548 = vperm.xlu1 %2179, %v215_v0   ;;  %v414_v50 = vrot.slane %v2636_v18, %v413_v24  ;;  %v418_v51 = vrot.slane %v2636_v18, %v417_v25  ;;  %v2688_v52 = vrot.slane %v438_v38, %v413_v24  ;;  %v2690_v53 = vrot.slane %v442_v39, %v413_v24 }
  0x2b   : > { %v2692_v56 = vrot.slane %v250_v40, %v245_v16  ;;  %v2694_v57 = vrot.slane %v258_v41, %v245_v16  ;;  %v2697_v58 = vrot.slane %v582_v42, %v2648_v28  ;;  %v2700_v59 = vrot.slane %v590_v43, %v2648_v28 }
  0x2c   : > { %v422_v60 = vrot.slane %v2638_v19, %v413_v24  ;;  %v426_v61 = vrot.slane %v2638_v19, %v417_v25  ;;  %v570_v62 = vrot.slane %v2636_v18, %v569_v47  ;;  %v578_v63 = vrot.slane %v2638_v19, %v569_v47 }
  0x2d   : > { %408 = vperm.xlu0 %2181, %v2617_v4   ;;  %3609 = vst [vmem:[#allocation8_spill] sm:$0xff] %v2700_v59  ;;  %v734_v5 = vrot.slane %v2640_v20, %v717_v54  ;;  %v742_v6 = vrot.slane %v2643_v22, %v717_v54  ;;  %v722_v7 = vrot.slane %v2636_v18, %v721_v55 }
  0x2e   : > { %552 = vperm.xlu1 %2179, %v216_v3   ;;  %v730_v8 = vrot.slane %v2638_v19, %v721_v55  ;;  %v2722_v13 = vrot.slane %v422_v60, %v413_v24  ;;  %v2724_v14 = vrot.slane %v426_v61, %v413_v24  ;;  %v2730_v16 = vrot.slane %v578_v63, %v2648_v28 }
  0x2f   : > { %v746_v23 = vrot.slane %v2643_v22, %v721_v55  ;;  %v2740_v25 = vrot.slane %v734_v5, %v717_v54  ;;  %v2744_v26 = vrot.slane %v722_v7, %v717_v54 }
  0x30   : > { %v2746_v27 = vrot.slane %v730_v8, %v717_v54 }
  0x31   : > { %2185 = vset.pattern.permute.xlu0 %v2526_v11  ;;  %3610 = vst [vmem:[#allocation9_spill] sm:$0xff] %v2744_v26 }
  0x32   : > { %2182 = vset.pattern.permute.xlu1 %v2523_v1  ;;  %556 = vperm.xlu0 %2185, %v217_v10   ;;  %v2708_v1 = vrot.slane %v418_v51, %v413_v24  ;;  %3611 = vst [vmem:[#allocation10_spill] sm:$0xff] %v2746_v27 }
  0x33   : > { %360 = vperm.xlu1 %2182, %v2617_v4  }
  0x36   : > { %2188 = vset.pattern.permute.xlu0 %v2527_v12 }
  0x37   : > { %2183 = vset.pattern.permute.xlu1 %v2525_v9  ;;  %712 = vperm.xlu0 %2188, %v2617_v4   ;;  %v718_v9 = vrot.slane %v2636_v18, %v717_v54 }
  0x38   : > { %404 = vperm.xlu1 %2183, %v217_v10  }
  0x39   : > { %v2748_v31 = vrot.slane %v718_v9, %v717_v54 }
  0x3b   : > { %2190 = vset.pattern.permute.xlu0 %v2528_v15  ;;  %3612 = vst [vmem:[#allocation11_spill] sm:$0xff] %v2748_v31 }
  0x3c   : > { %2184 = vset.pattern.permute.xlu1 %v2527_v12  ;;  %912 = vperm.xlu0 %2190, %v217_v10  }
  0x3d   : > { %700 = vperm.xlu1 %2184, %v215_v0  }
  0x40   : > { %1214 = vrot.lane.b32.xlu0 %v2634_v17, %s2529_s17 }
  0x41   : > { %704 = vperm.xlu1 %2184, %v216_v3  }
  0x45   : > { %2186 = vset.pattern.permute.xlu1 %v2526_v11  ;;  %v586_v11 = vrot.slane %v2640_v20, %v569_v47 }
  0x46   : > { %560 = vperm.xlu1 %2186, %v2617_v4  }
  0x47   : > { %v2753_v34 = vrot.slane %v586_v11, %v2648_v28 }
  0x49   : > { %3614 = vst [vmem:[#allocation13_spill] sm:$0xff] %v2753_v34 }
  0x4a   : > { %2187 = vset.pattern.permute.xlu1 %v2527_v12  ;;  %v594_v12 = vrot.slane %v2643_v22, %v569_v47  ;;  %v2766_v47 = vrot.slane %v746_v23, %v717_v54 }
  0x4b   : > { %708 = vperm.xlu1 %2187, %v217_v10   ;;  %v726_v10 = vrot.slane %v2638_v19, %v717_v54 }
  0x4c   : > { %3617 = vst [vmem:[#allocation16_spill] sm:$0xff] %v2766_v47 }
  0x4d   : > { %v2750_v33 = vrot.slane %v726_v10, %v717_v54 }
  0x4f   : > { %2189 = vset.pattern.permute.xlu1 %v2528_v15  ;;  %v2727_v15 = vrot.slane %v570_v62, %v2648_v28  ;;  %3613 = vst [vmem:[#allocation12_spill] sm:$0xff] %v2750_v33 }
  0x50   : > { %904 = vperm.xlu1 %2189, %v215_v0   ;;  %v2706_v0 = vrot.slane %v414_v50, %v413_v24  ;;  %v2742_v24 = vrot.slane %v742_v6, %v717_v54 }
  0x54   : > { %908 = vperm.xlu1 %2189, %v216_v3   ;;  %v566_v3 = vrot.slane %v2636_v18, %v2648_v28 }
  0x56   : > { %v2733_v21 = vrot.slane %v566_v3, %v2648_v28 }
  0x58   : > { %916 = vperm.xlu1 %2189, %v2617_v4   ;;  %v574_v4 = vrot.slane %v2638_v19, %v2648_v28  ;;  %v738_v19 = vrot.slane %v2640_v20, %v721_v55  ;;  %v2756_v20 = vrot.slane %v594_v12, %v2648_v28 }
  0x5a   : > { %v2736_v18 = vrot.slane %v574_v4, %v2648_v28  ;;  %3615 = vst [vmem:[#allocation14_spill] sm:$0xff] %v2756_v20  ;;  %v2764_v43 = vrot.slane %v738_v19, %v717_v54 }
  0x5c   : > { %1212 = vrot.lane.b32.xlu1 %v2661_v35, %s2529_s17  ;;  %3616 = vst [vmem:[#allocation15_spill] sm:$0xff] %v2764_v43  ;;  %s2077_s17 = sshll.u32 %s162_s11, 5 }
  0x5d   : > { %s164_s19 = scalar_lea.vmem [#allocation2], %s2077_s17 }
  0x5e   : > { %s2014_s24 = sshll.u32 %s164_s19, 4  ;;  %s3544_s24 = int_to_ptr.vmem [resolvable:$true] %s2014_s24 }
  0x5f   : > { %s2459_s28 = scalar_lea.vmem %s3544_s24, 512 }
  0x60   : > { %p2460_p11 = scmp.ne.s32.totalorder %s3544_s24, %s2459_s28 }
  0x62   : > { %p2461_p12 = pnand %p2460_p11, %p2594_p5 }
  0x64   : > { %p2462_p13 = pneg %p2461_p12 }
  0x96   : > { %v349_v29 = vpop.permute.xlu1 %348  ;;  %v222_v30 = vpop.permute.xlu0 %221 }
  0x97   : > { %v315_v22 = vmul.f32 %v2654_v32, %v222_v30  ;;  %v317_v38 = vmul.f32 %v2663_v36, %v222_v30  ;;  %v319_v39 = vmul.f32 %v2665_v37, %v222_v30  ;;  %v320_v40 = vmul.f32 %v2676_v44, %v222_v30 }
  0x98   : > { %v321_v41 = vmul.f32 %v2678_v45, %v222_v30  ;;  %v316_v42 = vmul.f32 %v2692_v56, %v222_v30  ;;  %v322_v50 = vmul.f32 %v2680_v46, %v222_v30  ;;  %v318_v51 = vmul.f32 %v2694_v57, %v222_v30 }
  0x99   : > { %v2769_v28 = vadd.f32 %v349_v29, %v319_v39  ;;  %v2772_v55 = vadd.f32 %v349_v29, %v315_v22  ;;  %v2778_v3 = vadd.f32 %v349_v29, %v317_v38  ;;  %v2780_v4 = vadd.f32 %v349_v29, %v320_v40 }
  0x9a   : > { %v2774_v60 = vadd.f32 %v349_v29, %v321_v41  ;;  %v353_v61 = vpop.permute.xlu1 %352  ;;  %v227_v62 = vpop.permute.xlu0 %226  ;;  %v2776_v63 = vadd.f32 %v349_v29, %v316_v42  ;;  %v2790_v19 = vadd.f32 %v349_v29, %v318_v51  ;;  %v2794_v30 = vadd.f32 %v349_v29, %v322_v50 }
  0x9b   : > { %3618 = vst [vmem:[#allocation17_spill] sm:$0xff] %v2780_v4  ;;  %v323_v54 = vmul.f32 %v2654_v32, %v227_v62  ;;  %v325_v5 = vmul.f32 %v2663_v36, %v227_v62  ;;  %v327_v6 = vmul.f32 %v2665_v37, %v227_v62  ;;  %v328_v7 = vmul.f32 %v2676_v44, %v227_v62 }
  0x9c   : > { %v329_v8 = vmul.f32 %v2678_v45, %v227_v62  ;;  %v330_v9 = vmul.f32 %v2680_v46, %v227_v62  ;;  %v324_v10 = vmul.f32 %v2692_v56, %v227_v62  ;;  %v326_v11 = vmul.f32 %v2694_v57, %v227_v62  ;;  %3619 = vst [vmem:[#allocation18_spill] sm:$0xff] %v2794_v30 }
  0x9d   : > { %v375_v12 = vadd.f32 %v353_v61, %v327_v6  ;;  %v2792_v23 = vadd.f32 %v353_v61, %v323_v54  ;;  %v2796_v40 = vadd.f32 %v353_v61, %v325_v5  ;;  %v376_v41 = vadd.f32 %v353_v61, %v328_v7 }
  0x9e   : > { %v377_v22 = vadd.f32 %v353_v61, %v329_v8  ;;  %v237_v38 = vpop.permute.xlu0 %236  ;;  %v372_v39 = vadd.f32 %v353_v61, %v324_v10  ;;  %v374_v62 = vadd.f32 %v353_v61, %v326_v11  ;;  %v378_v51 = vadd.f32 %v353_v61, %v330_v9 }
  0x9f   : > { %v401_v42 = vpop.permute.xlu1 %400  ;;  %v2799_v2 = vmul.f32 %v2654_v32, %v237_v38  ;;  %v2802_v17 = vmul.f32 %v2692_v56, %v237_v38  ;;  %v2809_v5 = vmul.f32 %v2663_v36, %v237_v38  ;;  %v2812_v7 = vmul.f32 %v2694_v57, %v237_v38 }
  0xa0   : > { %v495_v54 = vmul.f32 %v2682_v48, %v401_v42  ;;  %v496_v29 = vmul.f32 %v2684_v49, %v401_v42  ;;  %v497_v50 = vmul.f32 %v2688_v52, %v401_v42  ;;  %v498_v6 = vmul.f32 %v2690_v53, %v401_v42 }
  0xa1   : > { %v2815_v8 = vmul.f32 %v2665_v37, %v237_v38  ;;  %v2818_v10 = vmul.f32 %v2676_v44, %v237_v38  ;;  %v2821_v61 = vmul.f32 %v2678_v45, %v237_v38  ;;  %v2824_v9 = vmul.f32 %v2680_v46, %v237_v38 }
  0xa2   : > { %v492_v11 = vmul.f32 %v2708_v1, %v401_v42  ;;  %v494_v35 = vmul.f32 %v2724_v14, %v401_v42  ;;  %v2828_v47 = vadd.f32 %v495_v54, %v375_v12  ;;  %v2830_v20 = vadd.f32 %v497_v50, %v377_v22 }
  0xa3   : > { %v357_v30 = vpop.permute.xlu0 %356  ;;  %v491_v43 = vmul.f32 %v2706_v0, %v401_v42  ;;  %v493_v34 = vmul.f32 %v2722_v13, %v401_v42  ;;  %v2836_v27 = vadd.f32 %v496_v29, %v376_v41  ;;  %v2838_v38 = vadd.f32 %v498_v6, %v378_v51 }
  0xa4   : > { %3620 = vst [vmem:[#allocation19_spill] sm:$0xff] %v2828_v47  ;;  %3621 = vst [vmem:[#allocation20_spill] sm:$0xff] %v2830_v20  ;;  %v232_v4 = vpop.permute.xlu1 %231  ;;  %v524_v33 = vadd.f32 %v492_v11, %v372_v39  ;;  %v2834_v31 = vadd.f32 %v494_v35, %v374_v62 }
  0xa5   : > { %3622 = vst [vmem:[#allocation21_spill] sm:$0xff] %v2836_v27  ;;  %3623 = vst [vmem:[#allocation22_spill] sm:$0xff] %v2838_v38  ;;  %v331_v26 = vmul.f32 %v2654_v32, %v232_v4  ;;  %v332_v12 = vmul.f32 %v2692_v56, %v232_v4  ;;  %v333_v22 = vmul.f32 %v2663_v36, %v232_v4 }
  0xa6   : > { %v334_v54 = vmul.f32 %v2694_v57, %v232_v4  ;;  %v335_v50 = vmul.f32 %v2665_v37, %v232_v4  ;;  %v336_v42 = vmul.f32 %v2676_v44, %v232_v4  ;;  %v337_v39 = vmul.f32 %v2678_v45, %v232_v4 }
  0xa7   : > { %v338_v35 = vmul.f32 %v2680_v46, %v232_v4  ;;  %v2848_v41 = vadd.f32 %v357_v30, %v331_v26  ;;  %v2850_v62 = vadd.f32 %v357_v30, %v332_v12  ;;  %v2852_v51 = vadd.f32 %v357_v30, %v333_v22 }
  0xa8   : > { %v2854_v32 = vadd.f32 %v357_v30, %v334_v54  ;;  %v2856_v56 = vadd.f32 %v357_v30, %v335_v50  ;;  %v2858_v36 = vadd.f32 %v357_v30, %v336_v42  ;;  %v2860_v57 = vadd.f32 %v357_v30, %v337_v39  ;;  %v397_v44 = vpop.permute.xlu0 %396 }
  0xa9   : > { %v2862_v37 = vadd.f32 %v357_v30, %v338_v35  ;;  %v487_v45 = vmul.f32 %v2682_v48, %v397_v44  ;;  %v2866_v46 = vmul.f32 %v2684_v49, %v397_v44  ;;  %v489_v26 = vmul.f32 %v2688_v52, %v397_v44  ;;  %v2872_v29 = vpop.permute.xlu1 %548 }
  0xaa   : > { %3624 = vst [vmem:[#allocation23_spill] sm:$0xff] %v2858_v36  ;;  %v2870_v4 = vmul.f32 %v2690_v53, %v397_v44  ;;  %v2876_v6 = vmul.f32 %v2697_v58, %v2872_v29  ;;  %v2880_v30 = vmul.f32 %v2700_v59, %v2872_v29  ;;  %v484_v11 = vmul.f32 %v2708_v1, %v397_v44 }
  0xab   : > { %3625 = vst [vmem:[#allocation24_spill] sm:$0xff] %v2862_v37  ;;  %v636_v12 = vmul.f32 %v2727_v15, %v2872_v29  ;;  %v2886_v22 = vadd.f32 %v487_v45, %v2769_v28  ;;  %v2889_v54 = vadd.f32 %v489_v26, %v2774_v60  ;;  %v486_v50 = vmul.f32 %v2724_v14, %v397_v44 }
  0xac   : > { %3626 = vst [vmem:[#allocation25_spill] sm:$0xff] %v2870_v4  ;;  %3627 = vst [vmem:[#allocation26_spill] sm:$0xff] %v2876_v6  ;;  %v638_v42 = vmul.f32 %v2730_v16, %v2872_v29  ;;  %v409_v39 = vpop.permute.xlu0 %408  ;;  %v516_v35 = vadd.f32 %v484_v11, %v2776_v63  ;;  %v483_v37 = vmul.f32 %v2706_v0, %v397_v44 }
  0xad   : > { %3628 = vst [vmem:[#allocation27_spill] sm:$0xff] %v2880_v30  ;;  %3629 = vst [vmem:[#allocation28_spill] sm:$0xff] %v2886_v22  ;;  %v523_v36 = vadd.f32 %v491_v43, %v2792_v23  ;;  %v635_v20 = vmul.f32 %v2733_v21, %v2872_v29  ;;  %v2899_v28 = vpop.permute.xlu1 %552  ;;  %v2902_v60 = vmul.f32 %v2706_v0, %v409_v39 }
  0xae   : > { %3630 = vst [vmem:[#allocation29_spill] sm:$0xff] %v2889_v54  ;;  %v508_v45 = vmul.f32 %v2708_v1, %v409_v39  ;;  %v2906_v26 = vmul.f32 %v2722_v13, %v409_v39  ;;  %v510_v30 = vmul.f32 %v2724_v14, %v409_v39  ;;  %v2911_v63 = vmul.f32 %v2697_v58, %v2899_v28 }
  0xaf   : > { %v2915_v43 = vmul.f32 %v2700_v59, %v2899_v28  ;;  %v511_v23 = vmul.f32 %v2682_v48, %v409_v39  ;;  %v2919_v11 = vmul.f32 %v2684_v49, %v409_v39  ;;  %v513_v54 = vmul.f32 %v2688_v52, %v409_v39 }
  0xb0   : > { %3631 = vst [vmem:[#allocation30_spill] sm:$0xff] %v2911_v63  ;;  %v2923_v47 = vmul.f32 %v2690_v53, %v409_v39  ;;  %v644_v6 = vmul.f32 %v2727_v15, %v2899_v28  ;;  %v2927_v22 = vadd.f32 %v636_v12, %v516_v35  ;;  %v518_v63 = vadd.f32 %v486_v50, %v2790_v19 }
  0xb1   : > { %3632 = vst [vmem:[#allocation31_spill] sm:$0xff] %v2915_v43  ;;  %3633 = vst [vmem:[#allocation32_spill] sm:$0xff] %v2919_v11  ;;  %v646_v43 = vmul.f32 %v2730_v16, %v2899_v28  ;;  %v515_v38 = vadd.f32 %v483_v37, %v2772_v55  ;;  %v643_v11 = vmul.f32 %v2733_v21, %v2899_v28  ;;  %v2935_v4 = vpop.permute.xlu0 %556 }
  0xb2   : > { %3634 = vst [vmem:[#allocation33_spill] sm:$0xff] %v2923_v47  ;;  %v2937_v27 = vadd.f32 %v644_v6, %v524_v33  ;;  %v485_v39 = vmul.f32 %v2722_v13, %v397_v44  ;;  %v525_v47 = vadd.f32 %v493_v34, %v2796_v40  ;;  %v637_v12 = vmul.f32 %v2736_v18, %v2872_v29  ;;  %v361_v19 = vpop.permute.xlu1 %360 }
  0xb3   : > { %v2945_v50 = vmul.f32 %v2697_v58, %v2935_v4  ;;  %v2949_v55 = vmul.f32 %v2700_v59, %v2935_v4  ;;  %v670_v37 = vadd.f32 %v638_v42, %v518_v63  ;;  %v2952_v33 = vadd.f32 %v646_v43, %v2834_v31 }
  0xb4   : > { %v387_v44 = vadd.f32 %v361_v19, %v2799_v2  ;;  %v388_v34 = vadd.f32 %v361_v19, %v2802_v17  ;;  %v389_v40 = vadd.f32 %v361_v19, %v2809_v5  ;;  %v390_v6 = vadd.f32 %v361_v19, %v2812_v7 }
  0xb5   : > { %3635 = vst [vmem:[#allocation34_spill] sm:$0xff] %v2945_v50  ;;  %v391_v35 = vadd.f32 %v361_v19, %v2815_v8  ;;  %v2960_v50 = vadd.f32 %v361_v19, %v2818_v10  ;;  %v393_v59 = vadd.f32 %v361_v19, %v2821_v61  ;;  %v2964_v42 = vadd.f32 %v361_v19, %v2824_v9 }
  0xb6   : > { %v667_v31 = vadd.f32 %v635_v20, %v515_v38  ;;  %v2966_v63 = vadd.f32 %v643_v11, %v523_v36  ;;  %v517_v2 = vadd.f32 %v485_v39, %v2778_v3  ;;  %v645_v17 = vmul.f32 %v2736_v18, %v2899_v28  ;;  %v2975_v8 = vpop.permute.xlu0 %712 }
  0xb7   : > { %v2971_v5 = vadd.f32 %v511_v23, %v391_v35  ;;  %v2973_v7 = vadd.f32 %v513_v54, %v393_v59  ;;  %v2977_v10 = vadd.f32 %v508_v45, %v388_v34  ;;  %v652_v61 = vmul.f32 %v2727_v15, %v2935_v4  ;;  %v405_v9 = vpop.permute.xlu1 %404 }
  0xb8   : > { %v2983_v20 = vmul.f32 %v2740_v25, %v2975_v8  ;;  %v2987_v3 = vmul.f32 %v2742_v24, %v2975_v8  ;;  %v669_v38 = vadd.f32 %v637_v12, %v517_v2  ;;  %v677_v36 = vadd.f32 %v645_v17, %v525_v47 }
  0xb9   : > { %3636 = vst [vmem:[#allocation35_spill] sm:$0xff] %v2973_v7  ;;  %v499_v59 = vmul.f32 %v2706_v0, %v405_v9  ;;  %v500_v54 = vmul.f32 %v2708_v1, %v405_v9  ;;  %v501_v45 = vmul.f32 %v2722_v13, %v405_v9  ;;  %v502_v43 = vmul.f32 %v2724_v14, %v405_v9  ;;  %v3638_v0 = vld [vmem:[#allocation9_spill] sm:$0xff] }
  0xba   : > { %3637 = vst [vmem:[#allocation36_spill] sm:$0xff] %v2987_v3  ;;  %v503_v23 = vmul.f32 %v2682_v48, %v405_v9  ;;  %v2995_v11 = vmul.f32 %v2684_v49, %v405_v9  ;;  %v505_v39 = vmul.f32 %v2688_v52, %v405_v9  ;;  %v2999_v19 = vmul.f32 %v2690_v53, %v405_v9  ;;  %v3639_v52 = vld [vmem:[#allocation10_spill] sm:$0xff] }
  0xbb   : > { %v532_v47 = vadd.f32 %v500_v54, %v2850_v62  ;;  %v3004_v12 = vmul.f32 %v3638_v0, %v2975_v8  ;;  %v534_v1 = vadd.f32 %v502_v43, %v2854_v32  ;;  %v542_v13 = vadd.f32 %v510_v30, %v390_v6 }
  0xbc   : > { %v3008_v14 = vadd.f32 %v503_v23, %v2856_v56  ;;  %v3011_v48 = vadd.f32 %v505_v39, %v2860_v57  ;;  %v654_v49 = vmul.f32 %v2730_v16, %v2935_v4  ;;  %v3017_v53 = vmul.f32 %v3639_v52, %v2975_v8  ;;  %v3019_v62 = vpop.permute.xlu1 %700 }
  0xbd   : > { %v3021_v34 = vadd.f32 %v652_v61, %v532_v47  ;;  %v531_v32 = vadd.f32 %v499_v59, %v2848_v41  ;;  %v539_v30 = vadd.f32 %v2902_v60, %v387_v44  ;;  %v651_v56 = vmul.f32 %v2733_v21, %v2935_v4  ;;  %v3640_v41 = vld [vmem:[#allocation11_spill] sm:$0xff]  ;;  %v3641_v44 = vld [vmem:[#allocation12_spill] sm:$0xff] }
  0xbe   : > { %v3029_v57 = vmul.f32 %v2740_v25, %v3019_v62  ;;  %v3033_v6 = vmul.f32 %v2742_v24, %v3019_v62  ;;  %v788_v35 = vmul.f32 %v3638_v0, %v3019_v62  ;;  %v790_v2 = vmul.f32 %v3639_v52, %v3019_v62 }
  0xbf   : > { %v787_v60 = vmul.f32 %v3640_v41, %v3019_v62  ;;  %v789_v17 = vmul.f32 %v3641_v44, %v3019_v62  ;;  %v3043_v61 = vadd.f32 %v654_v49, %v534_v1  ;;  %v3045_v9 = vadd.f32 %v651_v56, %v531_v32 }
  0xc0   : > { %v820_v59 = vadd.f32 %v788_v35, %v2927_v22  ;;  %v822_v54 = vadd.f32 %v790_v2, %v670_v37  ;;  %v811_v43 = vmul.f32 %v3640_v41, %v2975_v8  ;;  %v533_v23 = vadd.f32 %v501_v45, %v2852_v51  ;;  %v3051_v39 = vpop.permute.xlu1 %704 }
  0xc1   : > { %v819_v47 = vadd.f32 %v787_v60, %v667_v31  ;;  %v821_v3 = vadd.f32 %v789_v17, %v669_v38  ;;  %v541_v7 = vadd.f32 %v2906_v26, %v389_v40  ;;  %v653_v1 = vmul.f32 %v2736_v18, %v2935_v4  ;;  %v3642_v60 = vld [vmem:[#allocation17_spill] sm:$0xff] }
  0xc2   : > { %v3058_v49 = vmul.f32 %v2740_v25, %v3051_v39  ;;  %v3062_v22 = vmul.f32 %v2742_v24, %v3051_v39  ;;  %v796_v51 = vmul.f32 %v3638_v0, %v3051_v39  ;;  %2199 = vtanh.f32 %v820_v59  ;;  %v3643_v59 = vld [vmem:[#allocation13_spill] sm:$0xff] }
  0xc3   : > { %v798_v37 = vmul.f32 %v3639_v52, %v3051_v39  ;;  %2201 = vtanh.f32 %v822_v54  ;;  %v795_v26 = vmul.f32 %v3640_v41, %v3051_v39  ;;  %v797_v40 = vmul.f32 %v3641_v44, %v3051_v39 }
  0xc4   : > { %v828_v31 = vadd.f32 %v796_v51, %v2937_v27  ;;  %2203 = vtanh.f32 %v819_v47  ;;  %v685_v38 = vadd.f32 %v653_v1, %v533_v23  ;;  %v813_v45 = vmul.f32 %v3641_v44, %v2975_v8  ;;  %v3645_v51 = vld [vmem:[#allocation21_spill] sm:$0xff] }
  0xc5   : > { %v830_v32 = vadd.f32 %v798_v37, %v2952_v33  ;;  %v827_v56 = vadd.f32 %v795_v26, %v2966_v63  ;;  %v829_v35 = vadd.f32 %v797_v40, %v677_v36  ;;  %2205 = vtanh.f32 %v821_v3  ;;  %v3077_v2 = vpop.permute.xlu1 %560  ;;  %v3644_v33 = vld [vmem:[#allocation8_spill] sm:$0xff] }
  0xc6   : > { %2207 = vtanh.f32 %v828_v31  ;;  %v520_v17 = vadd.f32 %v2866_v46, %v3642_v60  ;;  %v640_v27 = vmul.f32 %v3643_v59, %v2872_v29  ;;  %v648_v54 = vmul.f32 %v3643_v59, %v2899_v28 }
  0xc7   : > { %v3087_v23 = vmul.f32 %v2697_v58, %v3077_v2  ;;  %v3091_v63 = vmul.f32 %v3644_v33, %v3077_v2  ;;  %2209 = vtanh.f32 %v830_v32  ;;  %v660_v3 = vmul.f32 %v2727_v15, %v3077_v2  ;;  %v3646_v15 = vld [vmem:[#allocation15_spill] sm:$0xff] }
  0xc8   : > { %2211 = vtanh.f32 %v827_v56  ;;  %v662_v46 = vmul.f32 %v2730_v16, %v3077_v2  ;;  %v659_v36 = vmul.f32 %v2733_v21, %v3077_v2  ;;  %v661_v47 = vmul.f32 %v2736_v18, %v3077_v2  ;;  %v3647_v18 = vld [vmem:[#allocation18_spill] sm:$0xff] }
  0xc9   : > { %2213 = vtanh.f32 %v829_v35  ;;  %v692_v58 = vadd.f32 %v660_v3, %v2977_v10  ;;  %v672_v1 = vadd.f32 %v640_v27, %v520_v17  ;;  %v680_v37 = vadd.f32 %v648_v54, %v3645_v51  ;;  %v3648_v35 = vld [vmem:[#allocation25_spill] sm:$0xff]  ;;  %v3649_v10 = vld [vmem:[#allocation14_spill] sm:$0xff] }
  0xca   : > { %v694_v26 = vadd.f32 %v662_v46, %v542_v13  ;;  %v691_v40 = vadd.f32 %v659_v36, %v539_v30  ;;  %v693_v31 = vadd.f32 %v661_v47, %v541_v7  ;;  %v792_v32 = vmul.f32 %v3646_v15, %v3019_v62  ;;  %v3105_v56 = vpop.permute.xlu1 %708 }
  0xcb   : > { %v844_v16 = vadd.f32 %v3004_v12, %v692_v58  ;;  %v800_v21 = vmul.f32 %v3646_v15, %v3051_v39  ;;  %v522_v60 = vadd.f32 %v3648_v35, %v3647_v18  ;;  %v642_v17 = vmul.f32 %v3649_v10, %v2872_v29  ;;  %v3655_v18 = vld [vmem:[#allocation30_spill] sm:$0xff] }
  0xcc   : > { %v3114_v27 = vpop.eup %2199  ;;  %v3118_v7 = vmul.f32 %v2740_v25, %v3105_v56  ;;  %v3122_v13 = vmul.f32 %v2742_v24, %v3105_v56  ;;  %v804_v12 = vmul.f32 %v3638_v0, %v3105_v56  ;;  %v806_v30 = vmul.f32 %v3639_v52, %v3105_v56 }
  0xcd   : > { %v3128_v54 = vpop.eup %2201  ;;  %2215 = vtanh.f32 %v844_v16  ;;  %v846_v29 = vadd.f32 %v3017_v53, %v694_v26  ;;  %v803_v33 = vmul.f32 %v3640_v41, %v3105_v56  ;;  %v843_v25 = vadd.f32 %v811_v43, %v691_v40  ;;  %v3652_v40 = vld [vmem:[#allocation28_spill] sm:$0xff] }
  0xce   : > { %v3133_v3 = vpop.eup %2203  ;;  %v836_v24 = vadd.f32 %v804_v12, %v3021_v34  ;;  %v838_v46 = vadd.f32 %v806_v30, %v3043_v61  ;;  %v805_v0 = vmul.f32 %v3641_v44, %v3105_v56  ;;  %v845_v36 = vadd.f32 %v813_v45, %v693_v31  ;;  %v3650_v45 = vld [vmem:[#allocation16_spill] sm:$0xff]  ;;  %v3653_v31 = vld [vmem:[#allocation26_spill] sm:$0xff] }
  0xcf   : > { %v3139_v52 = vpop.eup %2205  ;;  %2217 = vtanh.f32 %v846_v29  ;;  %v835_v47 = vadd.f32 %v803_v33, %v3045_v9  ;;  %v824_v53 = vadd.f32 %v792_v32, %v672_v1  ;;  %v832_v58 = vadd.f32 %v800_v21, %v680_v37  ;;  %v3656_v29 = vld [vmem:[#allocation29_spill] sm:$0xff]  ;;  %v3657_v33 = vld [vmem:[#allocation27_spill] sm:$0xff] }
  0xd0   : > { %v3142_v51 = vpop.eup %2207  ;;  %2219 = vtanh.f32 %v836_v24  ;;  %v837_v41 = vadd.f32 %v805_v0, %v685_v38  ;;  %v650_v34 = vmul.f32 %v3649_v10, %v2899_v28  ;;  %v674_v43 = vadd.f32 %v642_v17, %v522_v60  ;;  %v3651_v28 = vld [vmem:[#allocation22_spill] sm:$0xff] }
  0xd1   : > { %v3146_v61 = vpop.eup %2209  ;;  %v888_v44 = vpack.c.bf16 %v3142_v51, %v3114_v27  ;;  %2221 = vtanh.f32 %v838_v46  ;;  %v794_v26 = vmul.f32 %v3650_v45, %v3019_v62  ;;  %v802_v9 = vmul.f32 %v3650_v45, %v3051_v39  ;;  %v3654_v39 = vld [vmem:[#allocation19_spill] sm:$0xff] }
  0xd2   : > { %v3154_v1 = vpop.eup %2211  ;;  %v890_v38 = vpack.c.bf16 %v3146_v61, %v3128_v54  ;;  %2223 = vtanh.f32 %v835_v47  ;;  %v682_v37 = vadd.f32 %v650_v34, %v3651_v28  ;;  %v671_v32 = vadd.f32 %v3653_v31, %v3652_v40  ;;  %v3659_v46 = vld [vmem:[#allocation31_spill] sm:$0xff] }
  0xd3   : > { %v3161_v16 = vpop.eup %2213  ;;  %936 = vmatprep.subr.bf16.mxu0 %v888_v44  ;;  %v887_v62 = vpack.c.bf16 %v3154_v1, %v3133_v3  ;;  %2225 = vtanh.f32 %v843_v25  ;;  %v826_v21 = vadd.f32 %v794_v26, %v674_v43  ;;  %v679_v35 = vadd.f32 %v3655_v18, %v3654_v39  ;;  %v3658_v25 = vld [vmem:[#allocation20_spill] sm:$0xff]  ;;  %v3660_v47 = vld [vmem:[#allocation23_spill] sm:$0xff] }
  0xd4   : > { %989 = vmatprep.subr.bf16.mxu1 %v890_v38  ;;  %v889_v60 = vpack.c.bf16 %v3161_v16, %v3139_v52  ;;  %2227 = vtanh.f32 %v837_v41  ;;  %v834_v17 = vadd.f32 %v802_v9, %v682_v37  ;;  %v823_v12 = vadd.f32 %v3029_v57, %v671_v32  ;;  %v3661_v41 = vld [vmem:[#allocation32_spill] sm:$0xff] }
  0xd5   : > { %937 = vmatpush1.bf16.msra.mxu0 %v887_v62  ;;  %2229 = vtanh.f32 %v845_v36  ;;  %v831_v30 = vadd.f32 %v3058_v49, %v679_v35  ;;  %v673_v24 = vadd.f32 %v3657_v33, %v3656_v29  ;;  %v681_v0 = vadd.f32 %v3659_v46, %v3658_v25  ;;  %v3662_v38 = vld [vmem:[#allocation24_spill] sm:$0xff]  ;;  %v3665_v33 = vld [vmem:[#allocation35_spill] sm:$0xff] }
  0xd6   : > { %990 = vmatpush1.bf16.msra.mxu1 %v889_v60  ;;  %2231 = vtanh.f32 %v824_v53  ;;  %v536_v34 = vadd.f32 %v2995_v11, %v3660_v47  ;;  %v544_v43 = vadd.f32 %v3661_v41, %v2960_v50  ;;  %v656_v57 = vmul.f32 %v3643_v59, %v2935_v4  ;;  %v3667_v47 = vld [vmem:[#allocation7_spill] sm:$0xff] }
  0xd7   : > { %v3181_v36 = vpop.eup %2215  ;;  %2233 = vtanh.f32 %v832_v58  ;;  %v825_v49 = vadd.f32 %v3033_v6, %v673_v24  ;;  %v833_v44 = vadd.f32 %v3062_v22, %v681_v0  ;;  %v664_v26 = vmul.f32 %v3643_v59, %v3077_v2  ;;  %v3663_v22 = vld [vmem:[#allocation33_spill] sm:$0xff] }
  0xd8   : > { %2235 = vtanh.f32 %v826_v21  ;;  %v688_v53 = vadd.f32 %v656_v57, %v536_v34  ;;  %v808_v11 = vmul.f32 %v3646_v15, %v3105_v56  ;;  %v816_v50 = vmul.f32 %v3646_v15, %v2975_v8 }
  0xd9   : > { %v3191_v9 = vpop.eup %2217  ;;  %2237 = vtanh.f32 %v834_v17  ;;  %v696_v58 = vadd.f32 %v664_v26, %v544_v43  ;;  %v538_v6 = vadd.f32 %v2999_v19, %v3662_v38  ;;  %v546_v28 = vadd.f32 %v3663_v22, %v2964_v42  ;;  %v3669_v38 = vld [vmem:[#allocation6_spill] sm:$0xff] }
  0xda   : > { %v3197_v59 = vpop.eup %2219  ;;  %2239 = vtanh.f32 %v823_v12  ;;  %v840_v37 = vadd.f32 %v808_v11, %v688_v53  ;;  %v658_v40 = vmul.f32 %v3649_v10, %v2935_v4  ;;  %v666_v15 = vmul.f32 %v3649_v10, %v3077_v2  ;;  %v3664_v10 = vld [vmem:[#allocation34_spill] sm:$0xff] }
  0xdb   : > { %v3203_v31 = vpop.eup %2221  ;;  %v896_v32 = vpack.c.bf16 %v3181_v36, %v3197_v59  ;;  %2241 = vtanh.f32 %v831_v30  ;;  %v848_v19 = vadd.f32 %v816_v50, %v696_v58  ;;  %v810_v42 = vmul.f32 %v3650_v45, %v3105_v56 }
  0xdc   : > { %v3209_v62 = vpop.eup %2223  ;;  %v898_v21 = vpack.c.bf16 %v3191_v9, %v3203_v31  ;;  %2243 = vtanh.f32 %v825_v49  ;;  %v690_v4 = vadd.f32 %v658_v40, %v538_v6  ;;  %v698_v39 = vadd.f32 %v666_v15, %v546_v28 }
  0xdd   : > { %v3213_v18 = vpop.eup %2225  ;;  %938 = vmatprep.subr.bf16.mxu0 %v896_v32  ;;  %2245 = vtanh.f32 %v833_v44  ;;  %v818_v2 = vmul.f32 %v3650_v45, %v2975_v8  ;;  %v687_v35 = vadd.f32 %v3664_v10, %v3008_v14  ;;  %v695_v56 = vadd.f32 %v3087_v23, %v2971_v5 }
  0xde   : > { %v3221_v60 = vpop.eup %2227  ;;  %991 = vmatprep.subr.bf16.mxu1 %v898_v21  ;;  %v895_v17 = vpack.c.bf16 %v3213_v18, %v3209_v62  ;;  %2247 = vtanh.f32 %v840_v37  ;;  %v842_v12 = vadd.f32 %v810_v42, %v690_v4  ;;  %v689_v30 = vadd.f32 %v2949_v55, %v3011_v48  ;;  %v3312_v42 = vld [vmem:[%s3587_s1] sm:$0xff]  ;;  %v3318_v21 = vld [vmem:[%s3587_s1 + $0x8] sm:$0xff]  ;;  %v3324_v4 = vld [vmem:[%s3587_s1 + $0x10] sm:$0xff] }
  0xdf   : > { %v3227_v29 = vpop.eup %2229  ;;  %2249 = vtanh.f32 %v848_v19  ;;  %v850_v8 = vadd.f32 %v818_v2, %v698_v39  ;;  %v839_v14 = vadd.f32 %v3118_v7, %v687_v35  ;;  %v847_v45 = vadd.f32 %v2983_v20, %v695_v56  ;;  %v3666_v7 = vld [vmem:[#allocation36_spill] sm:$0xff]  ;;  %v3331_v39 = vld [vmem:[%s3587_s1 + $0x18] sm:$0xff]  ;;  %v3335_v2 = vpop.permute.xlu1 %904 }
  0xe0   : > { %v3231_v5 = vpop.eup %2231  ;;  %939 = vmatpush1.bf16.msra.mxu0 %v895_v17  ;;  %v897_v23 = vpack.c.bf16 %v3227_v29, %v3221_v60  ;;  %2251 = vtanh.f32 %v842_v12  ;;  %v697_v24 = vadd.f32 %v3091_v63, %v3665_v33  ;;  %v841_v55 = vadd.f32 %v3122_v13, %v689_v30 }
  0xe1   : > { %v3238_v48 = vpop.eup %2233  ;;  %2253 = vtanh.f32 %v850_v8  ;;  %v3668_v34 = vmov 0   ;;  %v2530_v19 = vmov 6  }
  0xe2   : > { %v3240_v25 = vpop.eup %2235  ;;  %992 = vmatpush1.bf16.msra.mxu1 %v897_v23  ;;  %v892_v20 = vpack.c.bf16 %v3238_v48, %v3231_v5  ;;  %2255 = vtanh.f32 %v839_v14  ;;  %v849_v46 = vadd.f32 %v3666_v7, %v697_v24  ;;  %2191 = vset.pattern.permute.xlu1 %v2530_v19 }
  0xe3   : > { %v3245_v0 = vpop.eup %2237  ;;  %2089 = vmatmul.mubr.msk.bf16.vlgmr.msra.gmra.mrb[0].mxu0 %vm929_vm0, %v3667_v47  ;;  %2257 = vtanh.f32 %v847_v45  ;;  %2192 = vset.pattern.permute.xlu0 %v2530_v19  ;;  %v3337_v35 = vpop.permute.xlu1 %908 }
  0xe4   : > { %v3249_v63 = vpop.eup %2239  ;;  %1042 = vmatprep.subr.bf16.mxu0 %v892_v20  ;;  %v894_v13 = vpack.c.bf16 %v3245_v0, %v3240_v25  ;;  %2259 = vtanh.f32 %v841_v55  ;;  %978 = vmatprep.mubr.bf16.mxu0 %v3668_v34 }
  0xe5   : > { %v3254_v41 = vpop.eup %2241  ;;  %2091 = vmatmul.mubr.msk.bf16.vlgmr.msra.gmra.mrb[0].mxu1 %vm929_vm0, %v3667_v47  ;;  %2261 = vtanh.f32 %v849_v46  ;;  %1197 = vperm.xlu1 %2191, %v3312_v42  }
  0xe6   : > { %v3258_v43 = vpop.eup %2243  ;;  %1095 = vmatprep.subr.bf16.mxu1 %v894_v13  ;;  %v891_v57 = vpack.c.bf16 %v3254_v41, %v3249_v63  ;;  %1031 = vmatprep.mubr.bf16.mxu1 %v3668_v34  ;;  %v3347_v13 = vpop.permute.xlu0 %912 }
  0xe7   : > { %v3263_v49 = vpop.eup %2245  ;;  %1201 = vperm.xlu0 %2192, %v3318_v21  }
  0xe8   : > { %v3265_v44 = vpop.eup %2247  ;;  %1043 = vmatpush1.bf16.msra.mxu0 %v891_v57  ;;  %v893_v26 = vpack.c.bf16 %v3263_v49, %v3258_v43 }
  0xe9   : > { %v3269_v53 = vpop.eup %2249  ;;  %1205 = vperm.xlu1 %2191, %v3324_v4  }
  0xea   : > { %v3271_v11 = vpop.eup %2251  ;;  %1096 = vmatpush1.bf16.msra.mxu1 %v893_v26  ;;  %v900_v50 = vpack.c.bf16 %v3269_v53, %v3265_v44  ;;  %v3349_v26 = vpop.permute.xlu1 %916 }
  0xeb   : > { %v3275_v58 = vpop.eup %2253  ;;  %2090 = vmatmul.mubr.msk.bf16.gmra.mrb[4].mxu0 %vm929_vm0, %v3669_v38  ;;  %1530 = vrot.lane.b32.xlu0 %v3667_v47, %s2531_s30 }
  0xec   : > { %v3279_v6 = vpop.eup %2255  ;;  %1044 = vmatprep.subr.bf16.mxu0 %v900_v50  ;;  %v902_v22 = vpack.c.bf16 %v3275_v58, %v3271_v11  ;;  %1074 = vmatprep.mubr.bf16.mxu0 %v3668_v34 }
  0xed   : > { %v3284_v28 = vpop.eup %2257  ;;  %2092 = vmatmul.mubr.msk.bf16.gmra.mrb[4].mxu1 %vm929_vm0, %v3669_v38  ;;  %1209 = vperm.xlu1 %2191, %v3331_v39  }
  0xee   : > { %v3288_v37 = vpop.eup %2259  ;;  %1097 = vmatprep.subr.bf16.mxu1 %v902_v22  ;;  %v899_v40 = vpack.c.bf16 %v3284_v28, %v3279_v6  ;;  %1127 = vmatprep.mubr.bf16.mxu1 %v3668_v34 }
  0xef   : > { %v3293_v15 = vpop.eup %2261 }
  0xf0   : > { %1045 = vmatpush1.bf16.msra.mxu0 %v899_v40  ;;  %v901_v32 = vpack.c.bf16 %v3293_v15, %v3288_v37 }
  0xf1   : > { %1532 = vrot.lane.b32.xlu1 %v3669_v38, %s2531_s30  ;;  %s2463_s30 = sshll.u32 %s2535_s29, 4  ;;  %s2464_s30 = int_to_ptr.vmem [resolvable:$false] %s2463_s30 }
  0xf2   : > { %1098 = vmatpush1.bf16.msra.mxu1 %v901_v32  ;;  %s2465_s4 = scalar_lea.vmem %s2464_s30, 1024  ;;  %p2466_p0 = scmp.lt.s32.totalorder %s3544_s24, %s2464_s30 }
  0xf3   : > { %2093 = vmatmul.mubr.msk.bf16.vlgmr.msra.gmra.mrb[8].mxu0 %vm929_vm0, %v3667_v47  ;;  %p2467_p1 = scmp.lt.s32.totalorder %s2465_s4, %s2459_s28 }
  0xf4   : > { %1084 = vmatprep.mubr.bf16.mxu0 %v3668_v34 }
  0xf5   : > { %2095 = vmatmul.mubr.msk.bf16.vlgmr.msra.gmra.mrb[8].mxu1 %vm929_vm0, %v3667_v47  ;;  %p2468_p2 = por %p2467_p1, %p2466_p0 }
  0xf6   : > { %1137 = vmatprep.mubr.bf16.mxu1 %v3668_v34 }
  0xf7   : > { %p2469_p3 = pnand %p2468_p2, %p2462_p13 }
  0xfb   : > { %2094 = vmatmul.mubr.msk.bf16.gmra.mrb[12].mxu0 %vm929_vm0, %v3669_v38 }
  0xfc   : > { %1254 = vmatprep.mubr.bf16.mxu0 %v3668_v34 }
  0xfd   : > { %2096 = vmatmul.mubr.msk.bf16.gmra.mrb[12].mxu1 %vm929_vm0, %v3669_v38 }
  0xfe   : > { %1307 = vmatprep.mubr.bf16.mxu1 %v3668_v34 }
 0x1b6   : > { %v970_v10 = vpop.f32.mrb[0].mxu0 }
 0x1b7   : > { %v971_v56 = vadd.f32 %v970_v10, %v3335_v2  ;;  %v972_v17 = vpop.f32.mrb[1].mxu0 }
 0x1b8   : > { %v1023_v12 = vpop.f32.mrb[0].mxu1  ;;  %v973_v30 = vadd.f32 %v972_v17, %v3335_v2  ;;  %v974_v8 = vpop.f32.mrb[2].mxu0 }
 0x1b9   : > { %2263 = vtanh.f32 %v971_v56  ;;  %v1024_v14 = vadd.f32 %v1023_v12, %v3335_v2  ;;  %v1025_v45 = vpop.f32.mrb[1].mxu1  ;;  %v975_v23 = vadd.f32 %v974_v8, %v3337_v35  ;;  %v976_v33 = vpop.f32.mrb[3].mxu0 }
 0x1ba   : > { %2265 = vtanh.f32 %v973_v30  ;;  %v1026_v24 = vadd.f32 %v1025_v45, %v3335_v2  ;;  %v1027_v55 = vpop.f32.mrb[2].mxu1  ;;  %v977_v7 = vadd.f32 %v976_v33, %v3337_v35 }
 0x1bb   : > { %2267 = vtanh.f32 %v1024_v14  ;;  %v1028_v20 = vadd.f32 %v1027_v55, %v3337_v35  ;;  %v1029_v46 = vpop.f32.mrb[3].mxu1 }
 0x1bc   : > { %2269 = vtanh.f32 %v1026_v24  ;;  %v1030_v47 = vadd.f32 %v1029_v46, %v3337_v35 }
 0x1bd   : > { %2271 = vtanh.f32 %v975_v23 }
 0x1be   : > { %2273 = vtanh.f32 %v1028_v20  ;;  %v980_v57 = vpop.f32.mrb[4].mxu0 }
 0x1bf   : > { %2275 = vtanh.f32 %v977_v7  ;;  %v981_v50 = vadd.f32 %v980_v57, %v3347_v13  ;;  %v982_v38 = vpop.f32.mrb[5].mxu0 }
 0x1c0   : > { %2277 = vtanh.f32 %v1030_v47  ;;  %v1033_v22 = vpop.f32.mrb[4].mxu1  ;;  %v983_v40 = vadd.f32 %v982_v38, %v3347_v13  ;;  %v984_v32 = vpop.f32.mrb[6].mxu0 }
 0x1c1   : > { %2279 = vtanh.f32 %v981_v50  ;;  %v1034_v19 = vadd.f32 %v1033_v22, %v3347_v13  ;;  %v1035_v10 = vpop.f32.mrb[5].mxu1  ;;  %v985_v56 = vadd.f32 %v984_v32, %v3349_v26  ;;  %v986_v17 = vpop.f32.mrb[7].mxu0 }
 0x1c2   : > { %2281 = vtanh.f32 %v983_v40  ;;  %v1036_v12 = vadd.f32 %v1035_v10, %v3347_v13  ;;  %v1037_v30 = vpop.f32.mrb[6].mxu1  ;;  %v987_v45 = vadd.f32 %v986_v17, %v3349_v26 }
 0x1c3   : > { %v2264_v8 = vpop.eup %2263  ;;  %2283 = vtanh.f32 %v1034_v19  ;;  %v1038_v14 = vadd.f32 %v1037_v30, %v3349_v26  ;;  %v1039_v23 = vpop.f32.mrb[7].mxu1 }
 0x1c4   : > { %v2266_v33 = vpop.eup %2265  ;;  %2285 = vtanh.f32 %v1036_v12  ;;  %v1040_v24 = vadd.f32 %v1039_v23, %v3349_v26 }
 0x1c5   : > { %v2268_v55 = vpop.eup %2267  ;;  %2287 = vtanh.f32 %v985_v56 }
 0x1c6   : > { %v2270_v20 = vpop.eup %2269  ;;  %2289 = vtanh.f32 %v1038_v14  ;;  %v1076_v7 = vpop.f32.mrb[8].mxu0 }
 0x1c7   : > { %v2272_v46 = vpop.eup %2271  ;;  %2291 = vtanh.f32 %v987_v45  ;;  %v1077_v47 = vadd.f32 %v1076_v7, %v3335_v2  ;;  %v1078_v57 = vpop.f32.mrb[9].mxu0 }
 0x1c8   : > { %v2274_v50 = vpop.eup %2273  ;;  %2293 = vtanh.f32 %v1040_v24  ;;  %v1129_v38 = vpop.f32.mrb[8].mxu1  ;;  %v1079_v22 = vadd.f32 %v1078_v57, %v3335_v2  ;;  %v1180_v32 = vpack.c.bf16 %v2272_v46, %v2264_v8 }
 0x1c9   : > { %v1080_v40 = vpop.f32.mrb[10].mxu0  ;;  %v2276_v19 = vpop.eup %2275  ;;  %2295 = vtanh.f32 %v1077_v47  ;;  %v1130_v10 = vadd.f32 %v1129_v38, %v3335_v2  ;;  %v1182_v30 = vpack.c.bf16 %v2274_v50, %v2268_v55 }
 0x1ca   : > { %v1131_v56 = vpop.f32.mrb[9].mxu1  ;;  %v1081_v17 = vadd.f32 %v1080_v40, %v3337_v35  ;;  %v1082_v12 = vpop.f32.mrb[11].mxu0  ;;  %2297 = vtanh.f32 %v1079_v22  ;;  %v1181_v24 = vpack.c.bf16 %v2276_v19, %v2266_v33 }
 0x1cb   : > { %v2278_v14 = vpop.eup %2277  ;;  %v1132_v45 = vadd.f32 %v1131_v56, %v3335_v2  ;;  %v1133_v23 = vpop.f32.mrb[10].mxu1  ;;  %2299 = vtanh.f32 %v1130_v10  ;;  %v1083_v8 = vadd.f32 %v1082_v12, %v3337_v35 }
 0x1cc   : > { %v2280_v7 = vpop.eup %2279  ;;  %v1134_v57 = vadd.f32 %v1133_v23, %v3337_v35  ;;  %v1135_v46 = vpop.f32.mrb[11].mxu1  ;;  %v1183_v47 = vpack.c.bf16 %v2278_v14, %v2270_v20  ;;  %1222 = vmatprep.subr.bf16.mxu0 %v1181_v24 }
 0x1cd   : > { %v2282_v38 = vpop.eup %2281  ;;  %2301 = vtanh.f32 %v1132_v45  ;;  %v1136_v40 = vadd.f32 %v1135_v46, %v3337_v35  ;;  %1223 = vmatpush1.bf16.msra.mxu0 %v1180_v32 }
 0x1ce   : > { %v2284_v55 = vpop.eup %2283  ;;  %2303 = vtanh.f32 %v1081_v17  ;;  %1275 = vmatprep.subr.bf16.mxu1 %v1183_v47  ;;  %v1086_v33 = vpop.f32.mrb[12].mxu0 }
 0x1cf   : > { %v2286_v2 = vpop.eup %2285  ;;  %2305 = vtanh.f32 %v1134_v57  ;;  %1276 = vmatpush1.bf16.msra.mxu1 %v1182_v30  ;;  %v1087_v22 = vadd.f32 %v1086_v33, %v3347_v13  ;;  %v1088_v19 = vpop.f32.mrb[13].mxu0 }
 0x1d0   : > { %v2288_v50 = vpop.eup %2287  ;;  %2307 = vtanh.f32 %v1083_v8  ;;  %v1139_v20 = vpop.f32.mrb[12].mxu1  ;;  %v1089_v56 = vadd.f32 %v1088_v19, %v3347_v13 }
 0x1d1   : > { %v2290_v10 = vpop.eup %2289  ;;  %2309 = vtanh.f32 %v1136_v40  ;;  %v1090_v35 = vpop.f32.mrb[14].mxu0  ;;  %v1188_v12 = vpack.c.bf16 %v2288_v50, %v2280_v7  ;;  %v1140_v32 = vadd.f32 %v1139_v20, %v3347_v13 }
 0x1d2   : > { %v2292_v14 = vpop.eup %2291  ;;  %2311 = vtanh.f32 %v1087_v22  ;;  %v1141_v17 = vpop.f32.mrb[13].mxu1  ;;  %v1091_v30 = vadd.f32 %v1090_v35, %v3349_v26  ;;  %v1190_v23 = vpack.c.bf16 %v2290_v10, %v2284_v55 }
 0x1d3   : > { %v1092_v45 = vpop.f32.mrb[15].mxu0  ;;  %v2294_v24 = vpop.eup %2293  ;;  %2313 = vtanh.f32 %v1089_v56  ;;  %v1142_v57 = vadd.f32 %v1141_v17, %v3347_v13  ;;  %v1189_v46 = vpack.c.bf16 %v2292_v14, %v2282_v38 }
 0x1d4   : > { %v1143_v8 = vpop.f32.mrb[14].mxu1  ;;  %v2296_v47 = vpop.eup %2295  ;;  %2315 = vtanh.f32 %v1140_v32  ;;  %v1093_v7 = vadd.f32 %v1092_v45, %v3349_v26  ;;  %v1191_v50 = vpack.c.bf16 %v2294_v24, %v2286_v2 }
 0x1d5   : > { %v1144_v40 = vadd.f32 %v1143_v8, %v3349_v26  ;;  %v1145_v33 = vpop.f32.mrb[15].mxu1  ;;  %v2298_v22 = vpop.eup %2297  ;;  %2317 = vtanh.f32 %v1142_v57  ;;  %1224 = vmatprep.subr.bf16.mxu0 %v1189_v46 }
 0x1d6   : > { %v1146_v19 = vadd.f32 %v1145_v33, %v3349_v26  ;;  %v2300_v55 = vpop.eup %2299  ;;  %2319 = vtanh.f32 %v1091_v30  ;;  %1277 = vmatprep.subr.bf16.mxu1 %v1191_v50  ;;  %1225 = vmatpush1.bf16.msra.mxu0 %v1188_v12  ;;  %v1213_v13 = vpop.permute.xlu1 %1212  ;;  %v2532_v50 = vmov 7  }
 0x1d7   : > { %v2302_v10 = vpop.eup %2301  ;;  %2321 = vtanh.f32 %v1144_v40  ;;  %1278 = vmatpush1.bf16.msra.mxu1 %v1190_v23  ;;  %v1215_v45 = vpop.permute.xlu0 %1214  ;;  %2194 = vset.pattern.permute.xlu1 %v2532_v50 }
 0x1d8   : > { %v2304_v38 = vpop.eup %2303  ;;  %2323 = vtanh.f32 %v1093_v7  ;;  %2193 = vset.pattern.permute.xlu0 %v2532_v50  ;;  %1519 = vperm.xlu1 %2194, %v3318_v21  }
 0x1d9   : > { %v2306_v20 = vpop.eup %2305  ;;  %2325 = vtanh.f32 %v1146_v19  ;;  %2097 = vmatmul.mubr.msk.bf16.vlgmr.msra.gmra.mrb[16].mxu0 %vm929_vm0, %v1213_v13  ;;  %v1184_v2 = vpack.c.bf16 %v2304_v38, %v2296_v47  ;;  %1515 = vperm.xlu0 %2193, %v3312_v42  }
 0x1da   : > { %v2308_v56 = vpop.eup %2307  ;;  %2099 = vmatmul.mubr.msk.bf16.vlgmr.msra.gmra.mrb[16].mxu1 %vm929_vm0, %v1213_v13  ;;  %v1186_v26 = vpack.c.bf16 %v2306_v20, %v2300_v55  ;;  %1264 = vmatprep.mubr.bf16.mxu0 %v3668_v34  ;;  %v3398_v19 = vpop.permute.xlu1 %1197 }
 0x1db   : > { %v2310_v35 = vpop.eup %2309  ;;  %v1185_v14 = vpack.c.bf16 %v2308_v56, %v2298_v22  ;;  %1317 = vmatprep.mubr.bf16.mxu1 %v3668_v34  ;;  %v2198_v22 = vld [vmem:[%s3586_s0] ss:$0 sps:$4 sm:$0xff]  }
 0x1dc   : > { %v2312_v12 = vpop.eup %2311  ;;  %v1187_v32 = vpack.c.bf16 %v2310_v35, %v2302_v10  ;;  %1523 = vperm.xlu1 %2194, %v3324_v4   ;;  %v3402_v10 = vpop.permute.xlu0 %1201 }
 0x1dd   : > { %v2314_v17 = vpop.eup %2313  ;;  %1328 = vmatprep.subr.bf16.mxu0 %v1185_v14  ;;  %1527 = vperm.xlu0 %2193, %v3331_v39  }
 0x1de   : > { %v2316_v30 = vpop.eup %2315  ;;  %1381 = vmatprep.subr.bf16.mxu1 %v1187_v32  ;;  %1329 = vmatpush1.bf16.msra.mxu0 %v1184_v2  ;;  %v3400_v55 = vpop.permute.xlu1 %1205 }
 0x1df   : > { %v2318_v23 = vpop.eup %2317  ;;  %1382 = vmatpush1.bf16.msra.mxu1 %v1186_v26 }
 0x1e0   : > { %v2320_v24 = vpop.eup %2319  ;;  %1810 = vrot.lane.b32.xlu1 %v2198_v22, %s2533_s8 }
 0x1e1   : > { %v2322_v57 = vpop.eup %2321  ;;  %2098 = vmatmul.mubr.msk.bf16.gmra.mrb[20].mxu0 %vm929_vm0, %v1215_v45  ;;  %v1192_v8 = vpack.c.bf16 %v2320_v24, %v2312_v12 }
 0x1e2   : > { %v2324_v46 = vpop.eup %2323  ;;  %2100 = vmatmul.mubr.msk.bf16.gmra.mrb[20].mxu1 %vm929_vm0, %v1215_v45  ;;  %v1194_v47 = vpack.c.bf16 %v2322_v57, %v2316_v30  ;;  %1360 = vmatprep.mubr.bf16.mxu0 %v3668_v34 }
 0x1e3   : > { %v2326_v40 = vpop.eup %2325  ;;  %v1193_v7 = vpack.c.bf16 %v2324_v46, %v2314_v17  ;;  %1413 = vmatprep.mubr.bf16.mxu1 %v3668_v34 }
 0x1e4   : > { %v1195_v33 = vpack.c.bf16 %v2326_v40, %v2318_v23 }
 0x1e5   : > { %1330 = vmatprep.subr.bf16.mxu0 %v1193_v7 }
 0x1e6   : > { %1383 = vmatprep.subr.bf16.mxu1 %v1195_v33  ;;  %1331 = vmatpush1.bf16.msra.mxu0 %v1192_v8 }
 0x1e7   : > { %1384 = vmatpush1.bf16.msra.mxu1 %v1194_v47 }
 0x1e9   : > { %2101 = vmatmul.mubr.msk.bf16.vlgmr.msra.gmra.mrb[24].mxu0 %vm929_vm0, %v1213_v13 }
 0x1ea   : > { %2103 = vmatmul.mubr.msk.bf16.vlgmr.msra.gmra.mrb[24].mxu1 %vm929_vm0, %v1213_v13  ;;  %1370 = vmatprep.mubr.bf16.mxu0 %v3668_v34 }
 0x1eb   : > { %1423 = vmatprep.mubr.bf16.mxu1 %v3668_v34 }
 0x1f1   : > { %2102 = vmatmul.mubr.msk.bf16.gmra.mrb[28].mxu0 %vm929_vm0, %v1215_v45 }
 0x1f2   : > { %2104 = vmatmul.mubr.msk.bf16.gmra.mrb[28].mxu1 %vm929_vm0, %v1215_v45  ;;  %1572 = vmatprep.mubr.bf16.mxu0 %v3668_v34 }
 0x1f3   : > { %1625 = vmatprep.mubr.bf16.mxu1 %v3668_v34 }
 0x2ac   : > { %v1256_v13 = vpop.f32.mrb[16].mxu0 }
 0x2ad   : > { %v1257_v21 = vadd.f32 %v1256_v13, %v3398_v19  ;;  %v1309_v42 = vpop.f32.mrb[16].mxu1  ;;  %v1258_v38 = vpop.f32.mrb[17].mxu0 }
 0x2ae   : > { %v1310_v4 = vadd.f32 %v1309_v42, %v3398_v19  ;;  %v1259_v39 = vadd.f32 %v1258_v38, %v3398_v19  ;;  %v1311_v20 = vpop.f32.mrb[17].mxu1  ;;  %v1260_v2 = vpop.f32.mrb[18].mxu0 }
 0x2af   : > { %v1434_v56 = vadd.f32 %v3133_v3, %v1257_v21  ;;  %v1312_v26 = vadd.f32 %v1311_v20, %v3398_v19  ;;  %v1261_v35 = vadd.f32 %v1260_v2, %v3402_v10  ;;  %v1313_v14 = vpop.f32.mrb[18].mxu1  ;;  %v1262_v12 = vpop.f32.mrb[19].mxu0 }
 0x2b0   : > { %v1436_v32 = vadd.f32 %v3139_v52, %v1310_v4  ;;  %v1435_v17 = vadd.f32 %v3114_v27, %v1259_v39  ;;  %v1314_v30 = vadd.f32 %v1313_v14, %v3402_v10  ;;  %v1263_v45 = vadd.f32 %v1262_v12, %v3402_v10  ;;  %v1315_v23 = vpop.f32.mrb[19].mxu1  ;;  %v3419_v27 = vpop.permute.xlu1 %1209 }
 0x2b1   : > { %2327 = vtanh.f32 %v1434_v56  ;;  %v1437_v24 = vadd.f32 %v3128_v54, %v1312_v26  ;;  %v1442_v3 = vadd.f32 %v3154_v1, %v1261_v35  ;;  %v1316_v57 = vadd.f32 %v1315_v23, %v3402_v10 }
 0x2b2   : > { %2329 = vtanh.f32 %v1436_v32  ;;  %v1444_v8 = vadd.f32 %v3161_v16, %v1314_v30  ;;  %v1443_v52 = vadd.f32 %v3142_v51, %v1263_v45 }
 0x2b3   : > { %2331 = vtanh.f32 %v1435_v17  ;;  %v1445_v46 = vadd.f32 %v3146_v61, %v1316_v57 }
 0x2b4   : > { %2333 = vtanh.f32 %v1437_v24  ;;  %v1266_v47 = vpop.f32.mrb[20].mxu0 }
 0x2b5   : > { %2335 = vtanh.f32 %v1442_v3  ;;  %v1267_v40 = vadd.f32 %v1266_v47, %v3400_v55  ;;  %v1319_v54 = vpop.f32.mrb[20].mxu1  ;;  %v1268_v7 = vpop.f32.mrb[21].mxu0 }
 0x2b6   : > { %2337 = vtanh.f32 %v1444_v8  ;;  %v1320_v1 = vadd.f32 %v1319_v54, %v3400_v55  ;;  %v1269_v33 = vadd.f32 %v1268_v7, %v3400_v55  ;;  %v1321_v16 = vpop.f32.mrb[21].mxu1  ;;  %v1270_v50 = vpop.f32.mrb[22].mxu0 }
 0x2b7   : > { %2339 = vtanh.f32 %v1443_v52  ;;  %v1450_v51 = vadd.f32 %v3209_v62, %v1267_v40  ;;  %v1322_v22 = vadd.f32 %v1321_v16, %v3400_v55  ;;  %v1271_v61 = vadd.f32 %v1270_v50, %v3419_v27  ;;  %v1323_v13 = vpop.f32.mrb[22].mxu1  ;;  %v1272_v21 = vpop.f32.mrb[23].mxu0 }
 0x2b8   : > { %2341 = vtanh.f32 %v1445_v46  ;;  %v1452_v42 = vadd.f32 %v3221_v60, %v1320_v1  ;;  %v1451_v38 = vadd.f32 %v3197_v59, %v1269_v33  ;;  %v1324_v4 = vadd.f32 %v1323_v13, %v3419_v27  ;;  %v1325_v39 = vpop.f32.mrb[23].mxu1 }
 0x2b9   : > { %2343 = vtanh.f32 %v1450_v51  ;;  %v1453_v20 = vadd.f32 %v3203_v31, %v1322_v22  ;;  %v1458_v2 = vadd.f32 %v3213_v18, %v1271_v61  ;;  %v1273_v62 = vadd.f32 %v1272_v21, %v3419_v27 }
 0x2ba   : > { %2345 = vtanh.f32 %v1452_v42  ;;  %v1460_v56 = vadd.f32 %v3227_v29, %v1324_v4  ;;  %v1326_v26 = vadd.f32 %v1325_v39, %v3419_v27 }
 0x2bb   : > { %v2328_v35 = vpop.eup %2327  ;;  %2347 = vtanh.f32 %v1451_v38  ;;  %v1459_v60 = vadd.f32 %v3181_v36, %v1273_v62 }
 0x2bc   : > { %v2330_v59 = vpop.eup %2329  ;;  %2349 = vtanh.f32 %v1453_v20  ;;  %v1461_v14 = vadd.f32 %v3191_v9, %v1326_v26  ;;  %v1362_v12 = vpop.f32.mrb[24].mxu0 }
 0x2bd   : > { %v2332_v32 = vpop.eup %2331  ;;  %2351 = vtanh.f32 %v1458_v2  ;;  %v1363_v31 = vadd.f32 %v1362_v12, %v3398_v19  ;;  %v1415_v18 = vpop.f32.mrb[24].mxu1 }
 0x2be   : > { %v1364_v17 = vpop.f32.mrb[25].mxu0  ;;  %v2334_v30 = vpop.eup %2333  ;;  %2353 = vtanh.f32 %v1460_v56  ;;  %v1416_v29 = vadd.f32 %v1415_v18, %v3398_v19 }
 0x2bf   : > { %v1365_v45 = vadd.f32 %v1364_v17, %v3398_v19  ;;  %v1417_v23 = vpop.f32.mrb[25].mxu1  ;;  %v1366_v24 = vpop.f32.mrb[26].mxu0  ;;  %2355 = vtanh.f32 %v1459_v60  ;;  %v1438_v3 = vadd.f32 %v3249_v63, %v1363_v31 }
 0x2c0   : > { %v2336_v36 = vpop.eup %2335  ;;  %v1418_v9 = vadd.f32 %v1417_v23, %v3398_v19  ;;  %v1367_v57 = vadd.f32 %v1366_v24, %v3402_v10  ;;  %v1419_v8 = vpop.f32.mrb[26].mxu1  ;;  %2357 = vtanh.f32 %v1461_v14  ;;  %v1440_v47 = vadd.f32 %v3258_v43, %v1416_v29 }
 0x2c1   : > { %v1368_v52 = vpop.f32.mrb[27].mxu0  ;;  %v2338_v46 = vpop.eup %2337  ;;  %v1439_v40 = vadd.f32 %v3231_v5, %v1365_v45  ;;  %v1420_v54 = vadd.f32 %v1419_v8, %v3402_v10  ;;  %2359 = vtanh.f32 %v1438_v3  ;;  %v1498_v13 = vpack.c.bf16 %v2336_v36, %v2328_v35 }
 0x2c2   : > { %v1421_v7 = vpop.f32.mrb[27].mxu1  ;;  %v2340_v1 = vpop.eup %2339  ;;  %v1441_v33 = vadd.f32 %v3240_v25, %v1418_v9  ;;  %v1446_v63 = vadd.f32 %v3254_v41, %v1367_v57  ;;  %v1369_v19 = vadd.f32 %v1368_v52, %v3402_v10  ;;  %2361 = vtanh.f32 %v1440_v47 }
 0x2c3   : > { %v2342_v16 = vpop.eup %2341  ;;  %v1448_v50 = vadd.f32 %v3263_v49, %v1420_v54  ;;  %v1422_v51 = vadd.f32 %v1421_v7, %v3402_v10  ;;  %v1499_v43 = vpack.c.bf16 %v2340_v1, %v2332_v32  ;;  %2363 = vtanh.f32 %v1439_v40 }
 0x2c4   : > { %v2344_v22 = vpop.eup %2343  ;;  %v1447_v5 = vadd.f32 %v3238_v48, %v1369_v19  ;;  %v1501_v61 = vpack.c.bf16 %v2342_v16, %v2334_v30  ;;  %2365 = vtanh.f32 %v1441_v33  ;;  %v1500_v41 = vpack.c.bf16 %v2338_v46, %v2330_v59  ;;  %v1372_v42 = vpop.f32.mrb[28].mxu0 }
 0x2c5   : > { %v2346_v21 = vpop.eup %2345  ;;  %v1449_v25 = vadd.f32 %v3245_v0, %v1422_v51  ;;  %1540 = vmatprep.subr.bf16.mxu0 %v1499_v43  ;;  %2367 = vtanh.f32 %v1446_v63  ;;  %v1373_v49 = vadd.f32 %v1372_v42, %v3400_v55  ;;  %v1425_v10 = vpop.f32.mrb[28].mxu1 }
 0x2c6   : > { %v2348_v38 = vpop.eup %2347  ;;  %1593 = vmatprep.subr.bf16.mxu1 %v1501_v61  ;;  %1541 = vmatpush1.bf16.msra.mxu0 %v1498_v13  ;;  %v1374_v4 = vpop.f32.mrb[29].mxu0  ;;  %2369 = vtanh.f32 %v1448_v50  ;;  %v1426_v48 = vadd.f32 %v1425_v10, %v3400_v55 }
 0x2c7   : > { %v2350_v39 = vpop.eup %2349  ;;  %1594 = vmatpush1.bf16.msra.mxu1 %v1500_v41  ;;  %v1375_v20 = vadd.f32 %v1374_v4, %v3400_v55  ;;  %v1427_v2 = vpop.f32.mrb[29].mxu1  ;;  %2371 = vtanh.f32 %v1447_v5  ;;  %v1454_v56 = vadd.f32 %v3279_v6, %v1373_v49 }
 0x2c8   : > { %v1376_v0 = vpop.f32.mrb[30].mxu0  ;;  %v2352_v62 = vpop.eup %2351  ;;  %v1428_v26 = vadd.f32 %v1427_v2, %v3400_v55  ;;  %2373 = vtanh.f32 %v1449_v25  ;;  %v1456_v12 = vadd.f32 %v3288_v37, %v1426_v48  ;;  %v2534_v25 = vmov 8  }
 0x2c9   : > { %v1377_v35 = vadd.f32 %v1376_v0, %v3419_v27  ;;  %v1429_v60 = vpop.f32.mrb[30].mxu1  ;;  %v1378_v59 = vpop.f32.mrb[31].mxu0  ;;  %v1455_v32 = vadd.f32 %v3265_v44, %v1375_v20  ;;  %2375 = vtanh.f32 %v1454_v56  ;;  %v1506_v3 = vpack.c.bf16 %v2352_v62, %v2344_v22  ;;  %2195 = vset.pattern.permute.xlu0 %v2534_v25 }
 0x2ca   : > { %v2354_v14 = vpop.eup %2353  ;;  %v1430_v31 = vadd.f32 %v1429_v60, %v3419_v27  ;;  %v1431_v18 = vpop.f32.mrb[31].mxu1  ;;  %v1457_v30 = vadd.f32 %v3271_v11, %v1428_v26  ;;  %v1379_v55 = vadd.f32 %v1378_v59, %v3419_v27  ;;  %2377 = vtanh.f32 %v1456_v12 }
 0x2cb   : > { %v2356_v17 = vpop.eup %2355  ;;  %v1462_v6 = vadd.f32 %v3284_v28, %v1377_v35  ;;  %v1432_v23 = vadd.f32 %v1431_v18, %v3419_v27  ;;  %2379 = vtanh.f32 %v1455_v32  ;;  %v1508_v28 = vpack.c.bf16 %v2354_v14, %v2346_v21  ;;  %v1533_v63 = vpop.permute.xlu1 %1532  ;;  %v1801_v21 = vld [vmem:[%s3587_s1] sm:$0xff] }
 0x2cc   : > { %v2358_v29 = vpop.eup %2357  ;;  %v1464_v45 = vadd.f32 %v3293_v15, %v1430_v31  ;;  %v1507_v37 = vpack.c.bf16 %v2356_v17, %v2348_v38  ;;  %v1463_v44 = vadd.f32 %v3269_v53, %v1379_v55  ;;  %2381 = vtanh.f32 %v1457_v30  ;;  %v1531_v15 = vpop.permute.xlu0 %1530  ;;  %1804 = vperm.xlu0 %2195, %v1801_v21  }
 0x2cd   : > { %v2360_v24 = vpop.eup %2359  ;;  %v1509_v36 = vpack.c.bf16 %v2358_v29, %v2350_v39  ;;  %v1465_v11 = vadd.f32 %v3275_v58, %v1432_v23  ;;  %2383 = vtanh.f32 %v1462_v6 }
 0x2ce   : > { %v2362_v9 = vpop.eup %2361  ;;  %1542 = vmatprep.subr.bf16.mxu0 %v1507_v37  ;;  %2385 = vtanh.f32 %v1464_v45 }
 0x2cf   : > { %v2364_v57 = vpop.eup %2363  ;;  %1595 = vmatprep.subr.bf16.mxu1 %v1509_v36  ;;  %1543 = vmatpush1.bf16.msra.mxu0 %v1506_v3  ;;  %2387 = vtanh.f32 %v1463_v44  ;;  %v3491_v38 = vpop.permute.xlu1 %1519 }
 0x2d0   : > { %v2366_v8 = vpop.eup %2365  ;;  %1596 = vmatpush1.bf16.msra.mxu1 %v1508_v28  ;;  %2389 = vtanh.f32 %v1465_v11  ;;  %v3489_v41 = vpop.permute.xlu0 %1515 }
 0x2d1   : > { %v2368_v27 = vpop.eup %2367 }
 0x2d2   : > { %v2370_v52 = vpop.eup %2369  ;;  %2105 = vmatmul.mubr.msk.bf16.vlgmr.msra.gmra.mrb[32].mxu0 %vm929_vm0, %v1531_v15  ;;  %v1502_v53 = vpack.c.bf16 %v2368_v27, %v2360_v24 }
 0x2d3   : > { %v2372_v46 = vpop.eup %2371  ;;  %2107 = vmatmul.mubr.msk.bf16.vlgmr.msra.gmra.mrb[32].mxu1 %vm929_vm0, %v1531_v15  ;;  %v1504_v58 = vpack.c.bf16 %v2370_v52, %v2362_v9  ;;  %1582 = vmatprep.mubr.bf16.mxu0 %v3668_v34  ;;  %v3500_v14 = vpop.permute.xlu1 %1523 }
 0x2d4   : > { %v2374_v47 = vpop.eup %2373  ;;  %v1503_v40 = vpack.c.bf16 %v2372_v46, %v2364_v57  ;;  %1635 = vmatprep.mubr.bf16.mxu1 %v3668_v34  ;;  %v3503_v31 = vpop.permute.xlu0 %1527 }
 0x2d5   : > { %v2376_v54 = vpop.eup %2375  ;;  %v1505_v7 = vpack.c.bf16 %v2374_v47, %v2366_v8 }
 0x2d6   : > { %v2378_v1 = vpop.eup %2377  ;;  %1646 = vmatprep.subr.bf16.mxu0 %v1503_v40 }
 0x2d7   : > { %v2380_v33 = vpop.eup %2379  ;;  %1699 = vmatprep.subr.bf16.mxu1 %v1505_v7  ;;  %1647 = vmatpush1.bf16.msra.mxu0 %v1502_v53 }
 0x2d8   : > { %v2382_v19 = vpop.eup %2381  ;;  %1700 = vmatpush1.bf16.msra.mxu1 %v1504_v58 }
 0x2d9   : > { %v2384_v16 = vpop.eup %2383 }
 0x2da   : > { %v2386_v50 = vpop.eup %2385  ;;  %2106 = vmatmul.mubr.msk.bf16.gmra.mrb[36].mxu0 %vm929_vm0, %v1533_v63  ;;  %v1510_v51 = vpack.c.bf16 %v2384_v16, %v2376_v54 }
 0x2db   : > { %v2388_v43 = vpop.eup %2387  ;;  %2108 = vmatmul.mubr.msk.bf16.gmra.mrb[36].mxu1 %vm929_vm0, %v1533_v63  ;;  %v1512_v22 = vpack.c.bf16 %v2386_v50, %v2378_v1  ;;  %1678 = vmatprep.mubr.bf16.mxu0 %v3668_v34 }
 0x2dc   : > { %v2390_v5 = vpop.eup %2389  ;;  %v1511_v61 = vpack.c.bf16 %v2388_v43, %v2380_v33  ;;  %1731 = vmatprep.mubr.bf16.mxu1 %v3668_v34 }
 0x2dd   : > { %v1513_v13 = vpack.c.bf16 %v2390_v5, %v2382_v19 }
 0x2de   : > { %1648 = vmatprep.subr.bf16.mxu0 %v1511_v61 }
 0x2df   : > { %1701 = vmatprep.subr.bf16.mxu1 %v1513_v13  ;;  %1649 = vmatpush1.bf16.msra.mxu0 %v1510_v51 }
 0x2e0   : > { %1702 = vmatpush1.bf16.msra.mxu1 %v1512_v22 }
 0x2e2   : > { %2109 = vmatmul.mubr.msk.bf16.vlgmr.msra.gmra.mrb[40].mxu0 %vm929_vm0, %v1531_v15 }
 0x2e3   : > { %2111 = vmatmul.mubr.msk.bf16.vlgmr.msra.gmra.mrb[40].mxu1 %vm929_vm0, %v1531_v15  ;;  %1688 = vmatprep.mubr.bf16.mxu0 %v3668_v34 }
 0x2e4   : > { %1741 = vmatprep.mubr.bf16.mxu1 %v3668_v34 }
 0x2ea   : > { %2110 = vmatmul.mubr.msk.bf16.gmra.mrb[44].mxu0 %vm929_vm0, %v1533_v63 }
 0x2eb   : > { %2112 = vmatmul.mubr.msk.bf16.gmra.mrb[44].mxu1 %vm929_vm0, %v1533_v63  ;;  %1847 = vmatprep.mubr.bf16.mxu0 %v3668_v34 }
 0x2ec   : > { %1888 = vmatprep.mubr.bf16.mxu1 %v3668_v34 }
 0x3a5   : > { %v1574_v42 = vpop.f32.mrb[32].mxu0 }
 0x3a6   : > { %v1627_v49 = vpop.f32.mrb[32].mxu1  ;;  %v1576_v10 = vpop.f32.mrb[33].mxu0  ;;  %v1575_v4 = vadd.f32 %v1574_v42, %v3489_v41 }
 0x3a7   : > { %v1629_v39 = vpop.f32.mrb[33].mxu1  ;;  %v1578_v48 = vpop.f32.mrb[34].mxu0  ;;  %v1577_v20 = vadd.f32 %v1576_v10, %v3489_v41  ;;  %v1628_v59 = vadd.f32 %v1627_v49, %v3489_v41 }
 0x3a8   : > { %v1631_v2 = vpop.f32.mrb[34].mxu1  ;;  %v1580_v0 = vpop.f32.mrb[35].mxu0  ;;  %v1630_v62 = vadd.f32 %v1629_v39, %v3489_v41  ;;  %2391 = vtanh.f32 %v1575_v4  ;;  %v1579_v35 = vadd.f32 %v1578_v48, %v3491_v38 }
 0x3a9   : > { %v1581_v56 = vadd.f32 %v1580_v0, %v3491_v38  ;;  %v1633_v26 = vpop.f32.mrb[35].mxu1  ;;  %2393 = vtanh.f32 %v1577_v20  ;;  %v1632_v12 = vadd.f32 %v1631_v2, %v3491_v38 }
 0x3aa   : > { %v1634_v60 = vadd.f32 %v1633_v26, %v3491_v38  ;;  %2395 = vtanh.f32 %v1630_v62 }
 0x3ab   : > { %2397 = vtanh.f32 %v1581_v56 }
 0x3ac   : > { %2399 = vtanh.f32 %v1634_v60 }
 0x3ad   : > { %v1584_v32 = vpop.f32.mrb[36].mxu0  ;;  %2401 = vtanh.f32 %v1579_v35 }
 0x3ae   : > { %v1637_v18 = vpop.f32.mrb[36].mxu1  ;;  %v1586_v17 = vpop.f32.mrb[37].mxu0  ;;  %2403 = vtanh.f32 %v1628_v59  ;;  %v1585_v30 = vadd.f32 %v1584_v32, %v3500_v14 }
 0x3af   : > { %v1639_v6 = vpop.f32.mrb[37].mxu1  ;;  %v1588_v55 = vpop.f32.mrb[38].mxu0  ;;  %2405 = vtanh.f32 %v1632_v12  ;;  %v1587_v29 = vadd.f32 %v1586_v17, %v3500_v14  ;;  %v1638_v11 = vadd.f32 %v1637_v18, %v3500_v14 }
 0x3b0   : > { %v1641_v45 = vpop.f32.mrb[38].mxu1  ;;  %v1590_v23 = vpop.f32.mrb[39].mxu0  ;;  %v1640_v37 = vadd.f32 %v1639_v6, %v3500_v14  ;;  %2407 = vtanh.f32 %v1585_v30  ;;  %v1589_v36 = vadd.f32 %v1588_v55, %v3503_v31 }
 0x3b1   : > { %v1591_v24 = vadd.f32 %v1590_v23, %v3503_v31  ;;  %v1643_v44 = vpop.f32.mrb[39].mxu1  ;;  %2409 = vtanh.f32 %v1587_v29  ;;  %v1642_v57 = vadd.f32 %v1641_v45, %v3503_v31 }
 0x3b2   : > { %v2392_v3 = vpop.eup %2391  ;;  %v1644_v9 = vadd.f32 %v1643_v44, %v3503_v31  ;;  %2411 = vtanh.f32 %v1640_v37  ;;  %v1811_v44 = vpop.permute.xlu1 %1810 }
 0x3b3   : > { %v2394_v28 = vpop.eup %2393  ;;  %2413 = vtanh.f32 %v1591_v24 }
 0x3b4   : > { %v2396_v15 = vpop.eup %2395  ;;  %2415 = vtanh.f32 %v1644_v9 }
 0x3b5   : > { %v2398_v8 = vpop.eup %2397  ;;  %v1680_v27 = vpop.f32.mrb[40].mxu0  ;;  %2417 = vtanh.f32 %v1589_v36 }
 0x3b6   : > { %v2400_v52 = vpop.eup %2399  ;;  %v1681_v53 = vadd.f32 %v1680_v27, %v3489_v41  ;;  %v1733_v46 = vpop.f32.mrb[40].mxu1  ;;  %v1786_v47 = vpack.c.bf16 %v2398_v8, %v2394_v28  ;;  %2419 = vtanh.f32 %v1638_v11 }
 0x3b7   : > { %v1682_v58 = vpop.f32.mrb[41].mxu0  ;;  %v2402_v40 = vpop.eup %2401  ;;  %v1734_v54 = vadd.f32 %v1733_v46, %v3489_v41  ;;  %v1788_v63 = vpack.c.bf16 %v2400_v52, %v2396_v15  ;;  %2421 = vtanh.f32 %v1642_v57 }
 0x3b8   : > { %v1683_v7 = vadd.f32 %v1682_v58, %v3489_v41  ;;  %v1735_v1 = vpop.f32.mrb[41].mxu1  ;;  %v1684_v33 = vpop.f32.mrb[42].mxu0  ;;  %2423 = vtanh.f32 %v1681_v53  ;;  %1815 = vmatprep.subr.bf16.mxu0 %v1786_v47  ;;  %v1785_v22 = vpack.c.bf16 %v2402_v40, %v2392_v3 }
 0x3b9   : > { %v2404_v19 = vpop.eup %2403  ;;  %v1736_v16 = vadd.f32 %v1735_v1, %v3489_v41  ;;  %v1685_v50 = vadd.f32 %v1684_v33, %v3491_v38  ;;  %v1737_v51 = vpop.f32.mrb[42].mxu1  ;;  %2425 = vtanh.f32 %v1734_v54  ;;  %1856 = vmatprep.subr.bf16.mxu1 %v1788_v63 }
 0x3ba   : > { %v1686_v43 = vpop.f32.mrb[43].mxu0  ;;  %v2406_v5 = vpop.eup %2405  ;;  %v1738_v61 = vadd.f32 %v1737_v51, %v3491_v38  ;;  %2427 = vtanh.f32 %v1683_v7  ;;  %1816 = vmatpush1.bf16.msra.mxu0 %v1785_v22 }
 0x3bb   : > { %v1739_v13 = vpop.f32.mrb[43].mxu1  ;;  %v2408_v21 = vpop.eup %2407  ;;  %v1687_v25 = vadd.f32 %v1686_v43, %v3491_v38  ;;  %v1787_v42 = vpack.c.bf16 %v2406_v5, %v2404_v19  ;;  %2429 = vtanh.f32 %v1736_v16 }
 0x3bc   : > { %v2410_v49 = vpop.eup %2409  ;;  %v1740_v41 = vadd.f32 %v1739_v13, %v3491_v38  ;;  %2431 = vtanh.f32 %v1685_v50  ;;  %v1805_v16 = vpop.permute.xlu0 %1804 }
 0x3bd   : > { %v2412_v10 = vpop.eup %2411  ;;  %1857 = vmatpush1.bf16.msra.mxu1 %v1787_v42  ;;  %2433 = vtanh.f32 %v1738_v61  ;;  %v1690_v39 = vpop.f32.mrb[44].mxu0 }
 0x3be   : > { %v2414_v4 = vpop.eup %2413  ;;  %2435 = vtanh.f32 %v1687_v25  ;;  %v1691_v20 = vadd.f32 %v1690_v39, %v3500_v14  ;;  %v1743_v2 = vpop.f32.mrb[44].mxu1 }
 0x3bf   : > { %v2416_v48 = vpop.eup %2415  ;;  %v1692_v0 = vpop.f32.mrb[45].mxu0  ;;  %v1794_v62 = vpack.c.bf16 %v2414_v4, %v2410_v49  ;;  %2437 = vtanh.f32 %v1740_v41  ;;  %v1744_v26 = vadd.f32 %v1743_v2, %v3500_v14 }
 0x3c0   : > { %v2418_v56 = vpop.eup %2417  ;;  %v1693_v35 = vadd.f32 %v1692_v0, %v3500_v14  ;;  %v1745_v38 = vpop.f32.mrb[45].mxu1  ;;  %v1796_v59 = vpack.c.bf16 %v2416_v48, %v2412_v10  ;;  %2439 = vtanh.f32 %v1691_v20 }
 0x3c1   : > { %v1694_v60 = vpop.f32.mrb[46].mxu0  ;;  %v2420_v12 = vpop.eup %2419  ;;  %v1746_v32 = vadd.f32 %v1745_v38, %v3500_v14  ;;  %1817 = vmatprep.subr.bf16.mxu0 %v1794_v62  ;;  %v1793_v6 = vpack.c.bf16 %v2418_v56, %v2408_v21  ;;  %2441 = vtanh.f32 %v1744_v26 }
 0x3c2   : > { %v1695_v18 = vadd.f32 %v1694_v60, %v3503_v31  ;;  %v1747_v17 = vpop.f32.mrb[46].mxu1  ;;  %v1696_v30 = vpop.f32.mrb[47].mxu0  ;;  %1858 = vmatprep.subr.bf16.mxu1 %v1796_v59  ;;  %2443 = vtanh.f32 %v1693_v35 }
 0x3c3   : > { %v2422_v55 = vpop.eup %2421  ;;  %v1748_v29 = vadd.f32 %v1747_v17, %v3503_v31  ;;  %v1749_v45 = vpop.f32.mrb[47].mxu1  ;;  %v1697_v37 = vadd.f32 %v1696_v30, %v3503_v31  ;;  %1818 = vmatpush1.bf16.msra.mxu0 %v1793_v6  ;;  %2445 = vtanh.f32 %v1746_v32 }
 0x3c4   : > { %v2424_v23 = vpop.eup %2423  ;;  %v1795_v24 = vpack.c.bf16 %v2422_v55, %v2420_v12  ;;  %v1750_v36 = vadd.f32 %v1749_v45, %v3503_v31  ;;  %2447 = vtanh.f32 %v1695_v18 }
 0x3c5   : > { %v2426_v14 = vpop.eup %2425  ;;  %2449 = vtanh.f32 %v1748_v29 }
 0x3c6   : > { %v2428_v3 = vpop.eup %2427  ;;  %1859 = vmatpush1.bf16.msra.mxu1 %v1795_v24  ;;  %2114 = vmatmul.mubr.msk.bf16.vlgmr.msra.gmra.mrb[48].mxu0 %vm929_vm0, %v1811_v44  ;;  %2451 = vtanh.f32 %v1697_v37 }
 0x3c7   : > { %v2430_v9 = vpop.eup %2429  ;;  %1929 = vmatprep.mubr.bf16.mxu0 %v3668_v34  ;;  %2453 = vtanh.f32 %v1750_v36 }
 0x3c8   : > { %v2432_v11 = vpop.eup %2431 }
 0x3c9   : > { %v2434_v28 = vpop.eup %2433  ;;  %2115 = vmatmul.mubr.msk.bf16.vlgmr.msra.gmra.mrb[48].mxu1 %vm929_vm0, %v1811_v44  ;;  %v1789_v57 = vpack.c.bf16 %v2432_v11, %v2424_v23 }
 0x3ca   : > { %v2436_v15 = vpop.eup %2435  ;;  %v1791_v8 = vpack.c.bf16 %v2434_v28, %v2426_v14  ;;  %1970 = vmatprep.mubr.bf16.mxu1 %v3668_v34 }
 0x3cb   : > { %v2438_v31 = vpop.eup %2437  ;;  %v1790_v27 = vpack.c.bf16 %v2436_v15, %v2428_v3 }
 0x3cc   : > { %v2440_v52 = vpop.eup %2439  ;;  %v1792_v53 = vpack.c.bf16 %v2438_v31, %v2430_v9 }
 0x3cd   : > { %v2442_v46 = vpop.eup %2441  ;;  %1897 = vmatprep.subr.bf16.mxu0 %v1790_v27 }
 0x3ce   : > { %v2444_v58 = vpop.eup %2443  ;;  %1938 = vmatprep.subr.bf16.mxu1 %v1792_v53  ;;  %1898 = vmatpush1.bf16.msra.mxu0 %v1789_v57 }
 0x3cf   : > { %v2446_v47 = vpop.eup %2445  ;;  %1939 = vmatpush1.bf16.msra.mxu1 %v1791_v8 }
 0x3d0   : > { %v2448_v40 = vpop.eup %2447 }
 0x3d1   : > { %v2450_v54 = vpop.eup %2449  ;;  %v1797_v7 = vpack.c.bf16 %v2448_v40, %v2440_v52 }
 0x3d2   : > { %v2452_v1 = vpop.eup %2451  ;;  %v1799_v33 = vpack.c.bf16 %v2450_v54, %v2442_v46 }
 0x3d3   : > { %v2454_v63 = vpop.eup %2453  ;;  %v1798_v34 = vpack.c.bf16 %v2452_v1, %v2444_v58 }
 0x3d4   : > { %v1800_v19 = vpack.c.bf16 %v2454_v63, %v2446_v47 }
 0x3d5   : > { %1899 = vmatprep.subr.bf16.mxu0 %v1798_v34 }
 0x3d6   : > { %1940 = vmatprep.subr.bf16.mxu1 %v1800_v19  ;;  %1900 = vmatpush1.bf16.msra.mxu0 %v1797_v7 }
 0x3d7   : > { %1941 = vmatpush1.bf16.msra.mxu1 %v1799_v33 }
 0x3d9   : > { %2116 = vmatmul.mubr.msk.bf16.vlgmr.msra.gmra.mrb[52].mxu0 %vm929_vm0, %v1811_v44 }
 0x3da   : > { %2117 = vmatmul.mubr.msk.bf16.vlgmr.msra.gmra.mrb[52].mxu1 %vm929_vm0, %v1811_v44 }
 0x499   : > { %v1849_v50 = vpop.f32.mrb[48].mxu0 }
 0x49a   : > { %v1851_v51 = vpop.f32.mrb[49].mxu0  ;;  %v1850_v43 = vadd.f32 %v1849_v50, %v1805_v16 }
 0x49b   : > { %v1853_v5 = vpop.f32.mrb[50].mxu0  ;;  %v1852_v61 = vadd.f32 %v1851_v51, %v1805_v16 }
 0x49c   : > { %v1890_v22 = vpop.f32.mrb[48].mxu1  ;;  %v1854_v25 = vpop.f32.mrb[51].mxu0 }
 0x49d   : > { %v1892_v13 = vpop.f32.mrb[49].mxu1  ;;  %v1891_v21 = vadd.f32 %v1890_v22, %v1805_v16  ;;  %v1987_v41 = vcombine.low %v1850_v43, %v1852_v61 }
 0x49e   : > { %v1894_v42 = vpop.f32.mrb[50].mxu1  ;;  %v1893_v49 = vadd.f32 %v1892_v13, %v1805_v16 }
 0x49f   : > { %v1895_v10 = vpop.f32.mrb[51].mxu1  ;;  %1995 = vst [vmem:[%s164_s19] sm:$0x77] %v1987_v41 }
 0x4a0   : > { %v1988_v4 = vcombine.low %v1891_v21, %v1893_v49 }
 0x4a2   : > { %1996 = vst [vmem:[%s164_s19 + $0x8] sm:$0x77] %v1988_v4 }
 0x4ac   : > { %v1931_v39 = vpop.f32.mrb[52].mxu0 }
 0x4ad   : > { %v1932_v48 = vadd.f32 %v1931_v39, %v1805_v16  ;;  %v1972_v20 = vpop.f32.mrb[52].mxu1  ;;  %v1933_v2 = vpop.f32.mrb[53].mxu0 }
 0x4ae   : > { %v1973_v0 = vadd.f32 %v1972_v20, %v1805_v16  ;;  %v1934_v62 = vadd.f32 %v1933_v2, %v1805_v16  ;;  %v1974_v56 = vpop.f32.mrb[53].mxu1  ;;  %v1935_v26 = vpop.f32.mrb[54].mxu0 }
 0x4af   : > { %v1975_v35 = vadd.f32 %v1974_v56, %v1805_v16  ;;  %v1976_v38 = vpop.f32.mrb[54].mxu1  ;;  %v1936_v60 = vpop.f32.mrb[55].mxu0 }
 0x4b0   : > { %v1989_v59 = vcombine.low %v1932_v48, %v1934_v62  ;;  %v1977_v12 = vpop.f32.mrb[55].mxu1 }
 0x4b1   : > { %v1990_v32 = vcombine.low %v1973_v0, %v1975_v35 }
 0x4b2   : > { %1997 = vst [vmem:[%s164_s19 + $0x10] sm:$0x77] %v1989_v59 }
 0x4b3   : > { %1998 = vst [vmem:[%s164_s19 + $0x18] sm:$0x77] %v1990_v32 }
 0x4b4   : > { %2472 = shalt.err (!%p2469_p3)
}
 0x4b5   : > { %s2473_s5 = scalar_lea.hbm %s3542_s27, 512  ;;  %s2477_s8 = scalar_lea.hbm %s3589_s3, 2048 }
 0x4b6   : > { %p2474_p4 = scmp.ne.s32.totalorder %s3542_s27, %s2473_s5  ;;  %p2478_p9 = scmp.lt.u32.totalorder %s3542_s27, %s3589_s3 }
 0x4b7   : > { %p2479_p10 = scmp.lt.u32.totalorder %s2477_s8, %s2473_s5  ;;  %p2481_p12 = scmp.lt.u32.totalorder %s2473_s5, %s3542_s27 }
 0x4b8   : > { %p2475_p7 = pnand %p2474_p4, %p2594_p5 }
 0x4b9   : > { %p2480_p11 = por %p2479_p10, %p2478_p9 }
 0x4ba   : > { %p2476_p8 = pneg %p2475_p7 }
 0x4bb   : > { %p2482_p13 = por %p2481_p12, %p2480_p11 }
 0x4bd   : > { %p2483_p0 = pnand %p2482_p13, %p2476_p8 }
 0x4bf   : > { %2486 = shalt.err (!%p2483_p0)
}
 0x4c0   : > { %2124 = dma.vmem_to_hbm [thread:$0]  (%p2594_p5), %s3544_s24, 512, %s3542_s27, %s2000_s16  }
 0x4c1 PF: > { %p2130_p1 = scmp.ge.s32.totalorder %s2521_s15, 2  ;;  %s2026_s11 = sand.u32 1, %s2509_s12  }
 0x4c2   : > { %s2027_s17 = scalar_lea.sflag [#allocation3], %s2026_s11 }
 0x4c3   : > { %p2127_p2 = pnand %p2130_p1, %p2598_p6 }
 0x4c5   : > { %2504 = dma.done.wait (!%p2127_p2), %s2027_s17, 512  }
 0x4c6   : > { %2506 = vsyncadd (!%p2127_p2), %s2027_s17, 4294966784  ;;  %p13_p3 = scmp.ge.s32.totalorder %s2581_s18, 6   ;;  %s3670_s12 = smov %s2513_s13 }
 0x4c7   : > { %s3671_s13 = smov %s2517_s14  ;;  %s3672_s14 = smov %s2592_s21 }
 0x4c8   : > { %s3673_s15 = smov %s2581_s18  ;;  %15 = sbr.rel (!%p13_p3) target bundleno = 3 (0x3), region = 81 }
 0x4cf   :  { %2032 = vsyncpa [#allocation3], 1 }
 0x4d0   :  { %2034 = vsyncpa [#allocation3 + $0x1], 1 }

</bundles_post_ra>
